<compile_context>
chip_gen: v6e
topology: v6e:2x2x1
jax: 0.10.0
libtpu: 0.0.40
codegen_flags: <defaults>
</compile_context>

<pallas_src>
import functools

import numpy as np
import jax
import jax.numpy as jnp
from jax.experimental import pallas as pl
from jax.experimental.pallas import tpu as pltpu

# ----------------------------- model config ---------------------------------
B = 2                 # batch
T = 8                 # sequence length
C = 32                # n_embd (= dim_att)
HEAD_SIZE = 16        # head_size_a
K = HEAD_SIZE
H = C // HEAD_SIZE    # n_head
BT = B * T
D_MIX = 32            # TIME_MIX_EXTRA_DIM
D_DECAY = 64          # TIME_DECAY_EXTRA_DIM
F_FFN = 96            # dim_ffn = int(3.5 * C) // 32 * 32
F_PAD = 128           # padded ffn hidden (lane-dense)
LN_EPS = 1e-5
GN_EPS = 1e-5 * (8.0 ** 2)   # RWKV ln_x GroupNorm eps = 1e-5 * head_size_divisor**2

F32 = jnp.float32
BF16 = jnp.bfloat16


def _ln(x, w, b, eps=LN_EPS):
    """LayerNorm over the last (channel) axis. x: (N, C); w, b: (1, C)."""
    mu = jnp.mean(x, axis=-1, keepdims=True)
    xc = x - mu
    var = jnp.mean(xc * xc, axis=-1, keepdims=True)
    return xc * jax.lax.rsqrt(var + eps) * w + b


def _build_masks():
    """Constant masks: per-batch cumulative-sum / total matmuls and (T,T) masks."""
    p = np.arange(BT)[:, None]
    q = np.arange(BT)[None, :]
    same = (p // T) == (q // T)
    cmask = np.stack([(same & (q <= p)), same]).astype(np.float32)   # (2, BT, BT)
    t = np.arange(T)[:, None]
    s = np.arange(T)[None, :]
    amask = np.stack([(s < t), (s == t)]).astype(np.float32)         # (2, T, T)
    return cmask, amask


_CMASK_NP, _AMASK_NP = _build_masks()


# ------------------------------ the kernel ----------------------------------
def rwkv_block_kernel(
    # inputs
    x_ref,            # (B, T, C)
    shift_att_ref,    # (B, 1, C)
    wkv_ref,          # (B, H, K, K)
    shift_ffn_ref,    # (B, 1, C)
    cmask_ref,        # (2, BT, BT) f32: [inclusive-tril-within-batch, all-within-batch]
    amask_ref,        # (2, T, T)  f32: [strict lower, identity]
    ln_w_ref,         # (4, C)   rows: ln0, ln1, ln2, ln_x
    ln_b_ref,         # (4, C)
    maa_ref,          # (6, C)   rows: time_maa_{x,w,k,v,r,g}
    maa_rkvg_ref,     # (1, 4C)  [maa_r | maa_k | maa_v | maa_g]
    maa_w1_ref,       # (C, 5*D_MIX)              bf16
    maa_w2bd_ref,     # (5*D_MIX, 5*C) block-diag bf16, output order [w|r|k|v|g]
    decay_ref,        # (1, C)   time_decay
    decay_w1_ref,     # (C, D_DECAY)              bf16
    decay_w2_ref,     # (D_DECAY, C)              bf16
    u_ref,            # (1, C)   time_faaaa flattened
    w_rkvg_bd_ref,    # (4C, 4C) block-diag       bf16, blocks [r,k,v,g]
    w_out_ref,        # (C, C)                    bf16
    cmaa_ref,         # (2, C)   channel-mix time_maa_{k,r}
    wk_ffn_ref,       # (C, F_PAD)                bf16 (zero padded)
    wv_ffn_ref,       # (F_PAD, C)                bf16 (zero padded)
    wr_ffn_ref,       # (C, C)                    bf16
    # outputs
    y_ref,            # (B, T, C)
    o_shift_att_ref,  # (B, 1, C)
    o_wkv_ref,        # (B, H, K, K)
    o_shift_ffn_ref,  # (B, 1, C)
):
    # ---- gather (B*T, C) token matrix ----
    x = jnp.concatenate([x_ref[b] for b in range(B)], axis=0)          # (BT, C)

    # ----- ln0 (layer_id == 0) -----
    x = _ln(x, ln_w_ref[0:1, :], ln_b_ref[0:1, :])

    # ============================ TimeMix ====================================
    xln1 = _ln(x, ln_w_ref[1:2, :], ln_b_ref[1:2, :])                  # (BT, C)

    # per-batch token shift
    prev = jnp.concatenate(
        [jnp.concatenate([shift_att_ref[b], xln1[b * T:(b + 1) * T - 1, :]], axis=0)
         for b in range(B)], axis=0)                                   # (BT, C)
    xx = prev - xln1

    # data-dependent token-shift mixing (single fused block-diagonal matmul)
    xxx = xln1 + xx * maa_ref[0:1, :]                                  # time_maa_x
    tm = jnp.tanh(jnp.dot(xxx.astype(BF16), maa_w1_ref[...],
                          preferred_element_type=F32))                 # (BT, 5*D_MIX)
    mods = jnp.dot(tm.astype(BF16), maa_w2bd_ref[...],
                   preferred_element_type=F32)                         # (BT, 5C) [w|r|k|v|g]
    m_w = mods[:, 0:C]
    m_rkvg = mods[:, C:5 * C]                                          # (BT, 4C) [r|k|v|g]

    # fused receptance/key/value/gate projection (lane-dense 128-wide matmul)
    xln1_4 = jnp.concatenate([xln1, xln1, xln1, xln1], axis=-1)        # (BT, 4C)
    xx_4 = jnp.concatenate([xx, xx, xx, xx], axis=-1)
    lhs_rkvg = xln1_4 + xx_4 * (maa_rkvg_ref[...] + m_rkvg)
    rkvg = jnp.dot(lhs_rkvg.astype(BF16), w_rkvg_bd_ref[...],
                   preferred_element_type=F32)                         # (BT, 4C)
    r2d = rkvg[:, 0:C]
    k2d = rkvg[:, C:2 * C]
    v2d = rkvg[:, 2 * C:3 * C]
    g2d = jax.nn.silu(rkvg[:, 3 * C:4 * C])

    # per-token, per-channel decay (log space): lw = -exp(decay + tanh(xw@W1)@W2)
    xw = xln1 + xx * (maa_ref[1:2, :] + m_w)
    ww = jnp.dot(
        jnp.tanh(jnp.dot(xw.astype(BF16), decay_w1_ref[...],
                         preferred_element_type=F32)).astype(BF16),
        decay_w2_ref[...], preferred_element_type=F32)
    lw = -jnp.exp(decay_ref[...] + ww)                                 # (BT, C), <= 0

    # chunked WKV: cumulative decays via constant masked matmuls (no scan)
    cum_incl = jnp.dot(cmask_ref[0], lw, preferred_element_type=F32)   # sum_{s<=t}
    cum_excl = cum_incl - lw                                           # sum_{s<t}
    tot = jnp.dot(cmask_ref[1], lw, preferred_element_type=F32)        # per-batch total

    r_dec = r2d * jnp.exp(cum_excl)          # r_t * W_t
    k_dec = k2d * jnp.exp(-cum_incl)         # k_s / W_{s+1}
    k_hat = k2d * jnp.exp(tot - cum_incl)    # k_s * W_T / W_{s+1}
    w_tot = jnp.exp(tot)                     # W_T
    duk = r2d * k2d * u_ref[...]             # diagonal "u" bonus terms

    slo = amask_ref[0]                       # strict lower triangular (T, T)
    eye = amask_ref[1]                       # identity (T, T)

    att_rows = []
    for b in range(B):
        rs = slice(b * T, (b + 1) * T)
        s0_all = wkv_ref[b]                                           # (H, K, K)
        y_heads = []
        sn_heads = []
        for h in range(H):
            cs = slice(h * K, (h + 1) * K)
            rd = r_dec[rs, cs]                                        # (T, K)
            kd = k_dec[rs, cs]                                        # (T, K)
            vv = v2d[rs, cs]                                          # (T, K)
            kh = k_hat[rs, cs]                                        # (T, K)
            s0 = s0_all[h]                                            # (K, K)

            # intra-chunk attention matrix + diagonal bonus
            A = jnp.einsum('tk,sk->ts', rd, kd, preferred_element_type=F32)  # (T, T)
            du = jnp.sum(duk[rs, cs], axis=-1, keepdims=True)                # (T, 1)
            A = A * slo + du * eye

            # y = A @ V  +  R~ @ S0
            yh = (jnp.dot(A, vv, preferred_element_type=F32)
                  + jnp.dot(rd, s0, preferred_element_type=F32))             # (T, K)

            # new state: diag(W_T) S0 + K^hat^T @ V
            wt = jnp.transpose(w_tot[b * T:b * T + 1, cs])                   # (K, 1)
            sn = wt * s0 + jnp.dot(jnp.transpose(kh), vv,
                                   preferred_element_type=F32)               # (K, K)
            sn_heads.append(sn[None])

            # ln_x GroupNorm (per token, per head) fused here
            mu = jnp.mean(yh, axis=-1, keepdims=True)
            yc = yh - mu
            var = jnp.mean(yc * yc, axis=-1, keepdims=True)
            y_heads.append(yc * jax.lax.rsqrt(var + GN_EPS))

        o_wkv_ref[b] = jnp.concatenate(sn_heads, axis=0)                     # (H, K, K)
        att_rows.append(jnp.concatenate(y_heads, axis=-1))                   # (T, C)

    att_n = jnp.concatenate(att_rows, axis=0)                                # (BT, C)
    att_n = att_n * ln_w_ref[3:4, :] + ln_b_ref[3:4, :]

    att_out = jnp.dot((att_n * g2d).astype(BF16), w_out_ref[...],
                      preferred_element_type=F32)
    x2 = x + att_out                                                         # residual 1

    # =========================== ChannelMix ==================================
    xln2 = _ln(x2, ln_w_ref[2:3, :], ln_b_ref[2:3, :])
    prev_f = jnp.concatenate(
        [jnp.concatenate([shift_ffn_ref[b], xln2[b * T:(b + 1) * T - 1, :]], axis=0)
         for b in range(B)], axis=0)
    xxf = prev_f - xln2
    xkf = xln2 + xxf * cmaa_ref[0:1, :]
    xrf = xln2 + xxf * cmaa_ref[1:2, :]

    kf = jnp.dot(xkf.astype(BF16), wk_ffn_ref[...], preferred_element_type=F32)
    kf = jnp.square(jax.nn.relu(kf))                                         # (BT, 128)
    kv = jnp.dot(kf.astype(BF16), wv_ffn_ref[...], preferred_element_type=F32)
    ffn_out = jax.nn.sigmoid(jnp.dot(xrf.astype(BF16), wr_ffn_ref[...],
                                     preferred_element_type=F32)) * kv
    x3 = x2 + ffn_out                                                        # residual 2

    # ============================== outputs ==================================
    for b in range(B):
        y_ref[b] = x3[b * T:(b + 1) * T, :]
        o_shift_att_ref[b] = xln1[b * T + T - 1:b * T + T, :]
        o_shift_ffn_ref[b] = xln2[b * T + T - 1:b * T + T, :]


# ------------------------------ the wrapper ---------------------------------
def _prep_weights(params):
    """Fuse / pad / cast parameters in plain JAX (outside the kernel)."""
    # block-diagonal r/k/v/g projection (4C, 4C), blocks in order r,k,v,g
    w_rkvg = params["w_rkvg"]
    wbd = jnp.zeros((4 * C, 4 * C), F32)
    for i in range(4):
        wbd = wbd.at[i * C:(i + 1) * C, i * C:(i + 1) * C].set(w_rkvg[i])
    # block-diagonal maa_w2: input blocks (w,k,v,r,g) -> output order [w,r,k,v,g]
    out_pos = (0, 2, 3, 1, 4)
    w2 = params["maa_w2"]
    w2bd = jnp.zeros((5 * D_MIX, 5 * C), F32)
    for i in range(5):
        p = out_pos[i]
        w2bd = w2bd.at[i * D_MIX:(i + 1) * D_MIX, p * C:(p + 1) * C].set(w2[i])
    # maa rows [r, k, v, g] lane-concatenated
    maa = params["maa"]
    maa_rkvg = jnp.concatenate([maa[4], maa[2], maa[3], maa[5]], axis=0).reshape(1, 4 * C)
    # FFN padding to 128 lanes (zero columns/rows contribute nothing)
    wk_pad = jnp.zeros((C, F_PAD), F32).at[:, :F_FFN].set(params["wk_ffn"])
    wv_pad = jnp.zeros((F_PAD, C), F32).at[:F_FFN, :].set(params["wv_ffn"])
    u2d = params["faaaa"].reshape(1, C)
    return dict(
        wbd=wbd.astype(BF16),
        w2bd=w2bd.astype(BF16),
        maa_rkvg=maa_rkvg,
        maa_w1=params["maa_w1"].astype(BF16),
        decay_w1=params["decay_w1"].astype(BF16),
        decay_w2=params["decay_w2"].astype(BF16),
        w_out=params["w_out"].astype(BF16),
        wk_pad=wk_pad.astype(BF16),
        wv_pad=wv_pad.astype(BF16),
        wr_ffn=params["wr_ffn"].astype(BF16),
        u2d=u2d,
    )


def _fs(shape):
    nd = len(shape)
    return pl.BlockSpec(shape, lambda i, nd=nd: (0,) * nd)


@functools.partial(jax.jit, donate_argnums=(1, 2, 3))
def rwkv_block_forward(x, shift_att, wkv_state, shift_ffn, params):
    w = _prep_weights(params)
    cmask = jnp.asarray(_CMASK_NP)
    amask = jnp.asarray(_AMASK_NP)

    in_arrays = [
        x, shift_att, wkv_state, shift_ffn,
        cmask, amask,
        params["ln_w"], params["ln_b"],
        params["maa"], w["maa_rkvg"], w["maa_w1"], w["w2bd"],
        params["decay"], w["decay_w1"], w["decay_w2"],
        w["u2d"], w["wbd"], w["w_out"],
        params["cmaa"], w["wk_pad"], w["wv_pad"], w["wr_ffn"],
    ]
    in_specs = [_fs(a.shape) for a in in_arrays]
    out_specs = (
        _fs((B, T, C)),
        _fs((B, 1, C)),
        _fs((B, H, K, K)),
        _fs((B, 1, C)),
    )
    out_shape = (
        jax.ShapeDtypeStruct((B, T, C), F32),
        jax.ShapeDtypeStruct((B, 1, C), F32),
        jax.ShapeDtypeStruct((B, H, K, K), F32),
        jax.ShapeDtypeStruct((B, 1, C), F32),
    )

    fn = pl.pallas_call(
        rwkv_block_kernel,
        out_shape=out_shape,
        grid_spec=pltpu.PrefetchScalarGridSpec(
            num_scalar_prefetch=0,
            grid=(1,),
            in_specs=in_specs,
            out_specs=out_specs,
        ),
        compiler_params=pltpu.CompilerParams(
            dimension_semantics=("arbitrary",)),
        # state in -> state out (shift_att, wkv, shift_ffn)
        input_output_aliases={1: 1, 2: 2, 3: 3},
    )
    y, new_shift_att, new_wkv, new_shift_ffn = fn(*in_arrays)
    # BlockState equivalent: ((new_shift_att, new_wkv), new_shift_ffn)
    return y, (new_shift_att, new_wkv), new_shift_ffn


# ------------------------- deterministic parameters --------------------------
def make_params(key):
    ks = jax.random.split(key, 16)
    n = lambda k, s, scale=0.1: scale * jax.random.normal(k, s, F32)
    return {
        "ln_w": 1.0 + 0.01 * jax.random.normal(ks[0], (4, C), F32),
        "ln_b": n(ks[1], (4, C), 0.01),
        "maa": 0.5 + n(ks[2], (6, C), 0.1),
        "maa_w1": n(ks[3], (C, 5 * D_MIX), 0.01),
        "maa_w2": n(ks[4], (5, D_MIX, C), 0.01),
        "decay": -0.5 + n(ks[5], (1, C), 0.1),
        "decay_w1": n(ks[6], (C, D_DECAY), 0.01),
        "decay_w2": n(ks[7], (D_DECAY, C), 0.01),
        "faaaa": n(ks[8], (H, HEAD_SIZE), 0.1),
        "w_rkvg": n(ks[9], (4, C, C), 0.1),
        "w_out": n(ks[10], (C, C), 0.1),
        "cmaa": 0.5 + n(ks[11], (2, C), 0.1),
        "wk_ffn": n(ks[12], (C, F_FFN), 0.1),
        "wv_ffn": n(ks[13], (F_FFN, C), 0.1),
        "wr_ffn": n(ks[14], (C, C), 0.1),
    }


if __name__ == "__main__":
    key = jax.random.PRNGKey(0)
    k_x, k_sa, k_wkv, k_sf, k_p = jax.random.split(key, 5)

    x = jax.random.normal(k_x, (B, T, C), F32)
    shift_att = jax.random.normal(k_sa, (B, 1, C), F32)
    wkv_state = 0.1 * jax.random.normal(k_wkv, (B, H, HEAD_SIZE, HEAD_SIZE), F32)
    shift_ffn = jax.random.normal(k_sf, (B, 1, C), F32)
    params = make_params(k_p)

    y, (new_shift_att, new_wkv), new_shift_ffn = rwkv_block_forward(
        x, shift_att, wkv_state, shift_ffn, params)
    jax.block_until_ready((y, new_shift_att, new_wkv, new_shift_ffn))
    print("KERNEL_OK")
</pallas_src>

<mosaic_0001>
module attributes {stable_mosaic.version = 11 : i64} {
  func.func @rwkv_block_kernel(%arg0: i32, %arg1: memref<2x8x32xf32, #tpu.memory_space<vmem>>, %arg2: memref<2x1x32xf32, #tpu.memory_space<vmem>>, %arg3: memref<2x2x16x16xf32, #tpu.memory_space<vmem>>, %arg4: memref<2x1x32xf32, #tpu.memory_space<vmem>>, %arg5: memref<2x16x16xf32, #tpu.memory_space<vmem>>, %arg6: memref<2x8x8xf32, #tpu.memory_space<vmem>>, %arg7: memref<4x32xf32, #tpu.memory_space<vmem>>, %arg8: memref<4x32xf32, #tpu.memory_space<vmem>>, %arg9: memref<6x32xf32, #tpu.memory_space<vmem>>, %arg10: memref<1x128xf32, #tpu.memory_space<vmem>>, %arg11: memref<32x160xbf16, #tpu.memory_space<vmem>>, %arg12: memref<160x160xbf16, #tpu.memory_space<vmem>>, %arg13: memref<1x32xf32, #tpu.memory_space<vmem>>, %arg14: memref<32x64xbf16, #tpu.memory_space<vmem>>, %arg15: memref<64x32xbf16, #tpu.memory_space<vmem>>, %arg16: memref<1x32xf32, #tpu.memory_space<vmem>>, %arg17: memref<128x128xbf16, #tpu.memory_space<vmem>>, %arg18: memref<32x32xbf16, #tpu.memory_space<vmem>>, %arg19: memref<2x32xf32, #tpu.memory_space<vmem>>, %arg20: memref<32x128xbf16, #tpu.memory_space<vmem>>, %arg21: memref<128x32xbf16, #tpu.memory_space<vmem>>, %arg22: memref<32x32xbf16, #tpu.memory_space<vmem>>, %arg23: memref<2x8x32xf32, #tpu.memory_space<vmem>>, %arg24: memref<2x1x32xf32, #tpu.memory_space<vmem>>, %arg25: memref<2x2x16x16xf32, #tpu.memory_space<vmem>>, %arg26: memref<2x1x32xf32, #tpu.memory_space<vmem>>) attributes {dimension_semantics = [#tpu.dimension_semantics<arbitrary>], iteration_bounds = array<i64: 1>, scalar_prefetch = 0 : i64, scratch_operands = 0 : i64, tpu.core_type = #tpu.core_type<tc>, window_params = [{pipeline_mode = #tpu.pipeline_mode<synchronous>, transform_indices = @transform_0, window_bounds = array<i64: 2, 8, 32>}, {pipeline_mode = #tpu.pipeline_mode<synchronous>, transform_indices = @transform_1, window_bounds = array<i64: 2, 1, 32>}, {pipeline_mode = #tpu.pipeline_mode<synchronous>, transform_indices = @transform_2, window_bounds = array<i64: 2, 2, 16, 16>}, {pipeline_mode = #tpu.pipeline_mode<synchronous>, transform_indices = @transform_3, window_bounds = array<i64: 2, 1, 32>}, {pipeline_mode = #tpu.pipeline_mode<synchronous>, transform_indices = @transform_4, window_bounds = array<i64: 2, 16, 16>}, {pipeline_mode = #tpu.pipeline_mode<synchronous>, transform_indices = @transform_5, window_bounds = array<i64: 2, 8, 8>}, {pipeline_mode = #tpu.pipeline_mode<synchronous>, transform_indices = @transform_6, window_bounds = array<i64: 4, 32>}, {pipeline_mode = #tpu.pipeline_mode<synchronous>, transform_indices = @transform_7, window_bounds = array<i64: 4, 32>}, {pipeline_mode = #tpu.pipeline_mode<synchronous>, transform_indices = @transform_8, window_bounds = array<i64: 6, 32>}, {pipeline_mode = #tpu.pipeline_mode<synchronous>, transform_indices = @transform_9, window_bounds = array<i64: 1, 128>}, {pipeline_mode = #tpu.pipeline_mode<synchronous>, transform_indices = @transform_10, window_bounds = array<i64: 32, 160>}, {pipeline_mode = #tpu.pipeline_mode<synchronous>, transform_indices = @transform_11, window_bounds = array<i64: 160, 160>}, {pipeline_mode = #tpu.pipeline_mode<synchronous>, transform_indices = @transform_12, window_bounds = array<i64: 1, 32>}, {pipeline_mode = #tpu.pipeline_mode<synchronous>, transform_indices = @transform_13, window_bounds = array<i64: 32, 64>}, {pipeline_mode = #tpu.pipeline_mode<synchronous>, transform_indices = @transform_14, window_bounds = array<i64: 64, 32>}, {pipeline_mode = #tpu.pipeline_mode<synchronous>, transform_indices = @transform_15, window_bounds = array<i64: 1, 32>}, {pipeline_mode = #tpu.pipeline_mode<synchronous>, transform_indices = @transform_16, window_bounds = array<i64: 128, 128>}, {pipeline_mode = #tpu.pipeline_mode<synchronous>, transform_indices = @transform_17, window_bounds = array<i64: 32, 32>}, {pipeline_mode = #tpu.pipeline_mode<synchronous>, transform_indices = @transform_18, window_bounds = array<i64: 2, 32>}, {pipeline_mode = #tpu.pipeline_mode<synchronous>, transform_indices = @transform_19, window_bounds = array<i64: 32, 128>}, {pipeline_mode = #tpu.pipeline_mode<synchronous>, transform_indices = @transform_20, window_bounds = array<i64: 128, 32>}, {pipeline_mode = #tpu.pipeline_mode<synchronous>, transform_indices = @transform_21, window_bounds = array<i64: 32, 32>}, {pipeline_mode = #tpu.pipeline_mode<synchronous>, transform_indices = @transform_22, window_bounds = array<i64: 2, 8, 32>}, {pipeline_mode = #tpu.pipeline_mode<synchronous>, transform_indices = @transform_23, window_bounds = array<i64: 2, 1, 32>}, {pipeline_mode = #tpu.pipeline_mode<synchronous>, transform_indices = @transform_24, window_bounds = array<i64: 2, 2, 16, 16>}, {pipeline_mode = #tpu.pipeline_mode<synchronous>, transform_indices = @transform_25, window_bounds = array<i64: 2, 1, 32>}]} {
    %c0 = arith.constant 0 : index
    %c0_0 = arith.constant 0 : index
    %c0_1 = arith.constant 0 : index
    %0 = vector.load %arg1[%c0, %c0_0, %c0_1] : memref<2x8x32xf32, #tpu.memory_space<vmem>>, vector<1x8x32xf32>
    %1 = vector.shape_cast %0 : vector<1x8x32xf32> to vector<8x32xf32>
    %c1 = arith.constant 1 : index
    %c0_2 = arith.constant 0 : index
    %c0_3 = arith.constant 0 : index
    %2 = vector.load %arg1[%c1, %c0_2, %c0_3] : memref<2x8x32xf32, #tpu.memory_space<vmem>>, vector<1x8x32xf32>
    %3 = vector.shape_cast %2 : vector<1x8x32xf32> to vector<8x32xf32>
    %4 = tpu.concatenate %1, %3 in 0 : vector<8x32xf32>, vector<8x32xf32> -> vector<16x32xf32>
    %c0_4 = arith.constant 0 : index
    %c0_5 = arith.constant 0 : index
    %5 = vector.load %arg7[%c0_4, %c0_5] : memref<4x32xf32, #tpu.memory_space<vmem>>, vector<1x32xf32>
    %c0_6 = arith.constant 0 : index
    %c0_7 = arith.constant 0 : index
    %6 = vector.load %arg8[%c0_6, %c0_7] : memref<4x32xf32, #tpu.memory_space<vmem>>, vector<1x32xf32>
    %cst = arith.constant dense<0.000000e+00> : vector<16xf32>
    %7 = vector.multi_reduction <add>, %4, %cst [1] : vector<16x32xf32> to vector<16xf32>
    %8 = vector.shape_cast %7 : vector<16xf32> to vector<16x1xf32>
    %cst_8 = arith.constant 3.200000e+01 : f32
    %9 = vector.broadcast %cst_8 : f32 to vector<16x1xf32>
    %10 = arith.divf %8, %9 : vector<16x1xf32>
    %11 = vector.broadcast %10 : vector<16x1xf32> to vector<16x32xf32>
    %12 = arith.subf %4, %11 : vector<16x32xf32>
    %13 = arith.mulf %12, %12 : vector<16x32xf32>
    %cst_9 = arith.constant dense<0.000000e+00> : vector<16xf32>
    %14 = vector.multi_reduction <add>, %13, %cst_9 [1] : vector<16x32xf32> to vector<16xf32>
    %15 = vector.shape_cast %14 : vector<16xf32> to vector<16x1xf32>
    %cst_10 = arith.constant 3.200000e+01 : f32
    %16 = vector.broadcast %cst_10 : f32 to vector<16x1xf32>
    %17 = arith.divf %15, %16 : vector<16x1xf32>
    %cst_11 = arith.constant 9.99999974E-6 : f32
    %18 = vector.broadcast %cst_11 : f32 to vector<16x1xf32>
    %19 = arith.addf %17, %18 : vector<16x1xf32>
    %20 = math.rsqrt %19 : vector<16x1xf32>
    %21 = vector.broadcast %20 : vector<16x1xf32> to vector<16x32xf32>
    %22 = arith.mulf %12, %21 : vector<16x32xf32>
    %23 = vector.broadcast %5 : vector<1x32xf32> to vector<16x32xf32>
    %24 = arith.mulf %22, %23 : vector<16x32xf32>
    %25 = vector.broadcast %6 : vector<1x32xf32> to vector<16x32xf32>
    %26 = arith.addf %24, %25 : vector<16x32xf32>
    %c1_12 = arith.constant 1 : index
    %c0_13 = arith.constant 0 : index
    %27 = vector.load %arg7[%c1_12, %c0_13] : memref<4x32xf32, #tpu.memory_space<vmem>>, vector<1x32xf32>
    %c1_14 = arith.constant 1 : index
    %c0_15 = arith.constant 0 : index
    %28 = vector.load %arg8[%c1_14, %c0_15] : memref<4x32xf32, #tpu.memory_space<vmem>>, vector<1x32xf32>
    %cst_16 = arith.constant dense<0.000000e+00> : vector<16xf32>
    %29 = vector.multi_reduction <add>, %26, %cst_16 [1] : vector<16x32xf32> to vector<16xf32>
    %30 = vector.shape_cast %29 : vector<16xf32> to vector<16x1xf32>
    %cst_17 = arith.constant 3.200000e+01 : f32
    %31 = vector.broadcast %cst_17 : f32 to vector<16x1xf32>
    %32 = arith.divf %30, %31 : vector<16x1xf32>
    %33 = vector.broadcast %32 : vector<16x1xf32> to vector<16x32xf32>
    %34 = arith.subf %26, %33 : vector<16x32xf32>
    %35 = arith.mulf %34, %34 : vector<16x32xf32>
    %cst_18 = arith.constant dense<0.000000e+00> : vector<16xf32>
    %36 = vector.multi_reduction <add>, %35, %cst_18 [1] : vector<16x32xf32> to vector<16xf32>
    %37 = vector.shape_cast %36 : vector<16xf32> to vector<16x1xf32>
    %cst_19 = arith.constant 3.200000e+01 : f32
    %38 = vector.broadcast %cst_19 : f32 to vector<16x1xf32>
    %39 = arith.divf %37, %38 : vector<16x1xf32>
    %cst_20 = arith.constant 9.99999974E-6 : f32
    %40 = vector.broadcast %cst_20 : f32 to vector<16x1xf32>
    %41 = arith.addf %39, %40 : vector<16x1xf32>
    %42 = math.rsqrt %41 : vector<16x1xf32>
    %43 = vector.broadcast %42 : vector<16x1xf32> to vector<16x32xf32>
    %44 = arith.mulf %34, %43 : vector<16x32xf32>
    %45 = vector.broadcast %27 : vector<1x32xf32> to vector<16x32xf32>
    %46 = arith.mulf %44, %45 : vector<16x32xf32>
    %47 = vector.broadcast %28 : vector<1x32xf32> to vector<16x32xf32>
    %48 = arith.addf %46, %47 : vector<16x32xf32>
    %c0_21 = arith.constant 0 : index
    %c0_22 = arith.constant 0 : index
    %c0_23 = arith.constant 0 : index
    %49 = vector.load %arg2[%c0_21, %c0_22, %c0_23] : memref<2x1x32xf32, #tpu.memory_space<vmem>>, vector<1x1x32xf32>
    %50 = vector.shape_cast %49 : vector<1x1x32xf32> to vector<1x32xf32>
    %51 = vector.extract_strided_slice %48 {offsets = [0, 0], sizes = [7, 32], strides = [1, 1]} : vector<16x32xf32> to vector<7x32xf32>
    %52 = tpu.concatenate %50, %51 in 0 : vector<1x32xf32>, vector<7x32xf32> -> vector<8x32xf32>
    %c1_24 = arith.constant 1 : index
    %c0_25 = arith.constant 0 : index
    %c0_26 = arith.constant 0 : index
    %53 = vector.load %arg2[%c1_24, %c0_25, %c0_26] : memref<2x1x32xf32, #tpu.memory_space<vmem>>, vector<1x1x32xf32>
    %54 = vector.shape_cast %53 : vector<1x1x32xf32> to vector<1x32xf32>
    %55 = vector.extract_strided_slice %48 {offsets = [8, 0], sizes = [7, 32], strides = [1, 1]} : vector<16x32xf32> to vector<7x32xf32>
    %56 = tpu.concatenate %54, %55 in 0 : vector<1x32xf32>, vector<7x32xf32> -> vector<8x32xf32>
    %57 = tpu.concatenate %52, %56 in 0 : vector<8x32xf32>, vector<8x32xf32> -> vector<16x32xf32>
    %58 = arith.subf %57, %48 : vector<16x32xf32>
    %c0_27 = arith.constant 0 : index
    %c0_28 = arith.constant 0 : index
    %59 = vector.load %arg9[%c0_27, %c0_28] : memref<6x32xf32, #tpu.memory_space<vmem>>, vector<1x32xf32>
    %60 = vector.broadcast %59 : vector<1x32xf32> to vector<16x32xf32>
    %61 = arith.mulf %58, %60 : vector<16x32xf32>
    %62 = arith.addf %48, %61 : vector<16x32xf32>
    %63 = arith.truncf %62 : vector<16x32xf32> to vector<16x32xbf16>
    %c0_29 = arith.constant 0 : index
    %c0_30 = arith.constant 0 : index
    %64 = vector.load %arg11[%c0_29, %c0_30] : memref<32x160xbf16, #tpu.memory_space<vmem>>, vector<32x160xbf16>
    %cst_31 = arith.constant dense<0.000000e+00> : vector<16x160xf32>
    %65 = tpu.matmul %63, %64, %cst_31 {dimension_numbers = #tpu.dot_dimension_numbers<[1], [0], [0], [1], [0, 0, 1, 1], [], []>} : vector<16x32xbf16>, vector<32x160xbf16>, vector<16x160xf32> -> vector<16x160xf32>
    %66 = math.tanh %65 : vector<16x160xf32>
    %67 = arith.truncf %66 : vector<16x160xf32> to vector<16x160xbf16>
    %c0_32 = arith.constant 0 : index
    %c0_33 = arith.constant 0 : index
    %68 = vector.load %arg12[%c0_32, %c0_33] : memref<160x160xbf16, #tpu.memory_space<vmem>>, vector<160x160xbf16>
    %cst_34 = arith.constant dense<0.000000e+00> : vector<16x160xf32>
    %69 = tpu.matmul %67, %68, %cst_34 {dimension_numbers = #tpu.dot_dimension_numbers<[1], [0], [0], [1], [0, 0, 1, 1], [], []>} : vector<16x160xbf16>, vector<160x160xbf16>, vector<16x160xf32> -> vector<16x160xf32>
    %70 = vector.extract_strided_slice %69 {offsets = [0, 0], sizes = [16, 32], strides = [1, 1]} : vector<16x160xf32> to vector<16x32xf32>
    %71 = vector.extract_strided_slice %69 {offsets = [0, 32], sizes = [16, 128], strides = [1, 1]} : vector<16x160xf32> to vector<16x128xf32>
    %72 = tpu.concatenate %48, %48, %48, %48 in 1 : vector<16x32xf32>, vector<16x32xf32>, vector<16x32xf32>, vector<16x32xf32> -> vector<16x128xf32>
    %73 = tpu.concatenate %58, %58, %58, %58 in 1 : vector<16x32xf32>, vector<16x32xf32>, vector<16x32xf32>, vector<16x32xf32> -> vector<16x128xf32>
    %c0_35 = arith.constant 0 : index
    %c0_36 = arith.constant 0 : index
    %74 = vector.load %arg10[%c0_35, %c0_36] : memref<1x128xf32, #tpu.memory_space<vmem>>, vector<1x128xf32>
    %75 = vector.broadcast %74 : vector<1x128xf32> to vector<16x128xf32>
    %76 = arith.addf %75, %71 : vector<16x128xf32>
    %77 = arith.mulf %73, %76 : vector<16x128xf32>
    %78 = arith.addf %72, %77 : vector<16x128xf32>
    %79 = arith.truncf %78 : vector<16x128xf32> to vector<16x128xbf16>
    %c0_37 = arith.constant 0 : index
    %c0_38 = arith.constant 0 : index
    %80 = vector.load %arg17[%c0_37, %c0_38] : memref<128x128xbf16, #tpu.memory_space<vmem>>, vector<128x128xbf16>
    %cst_39 = arith.constant dense<0.000000e+00> : vector<16x128xf32>
    %81 = tpu.matmul %79, %80, %cst_39 {dimension_numbers = #tpu.dot_dimension_numbers<[1], [0], [0], [1], [0, 0, 1, 1], [], []>} : vector<16x128xbf16>, vector<128x128xbf16>, vector<16x128xf32> -> vector<16x128xf32>
    %82 = vector.extract_strided_slice %81 {offsets = [0, 0], sizes = [16, 32], strides = [1, 1]} : vector<16x128xf32> to vector<16x32xf32>
    %83 = vector.extract_strided_slice %81 {offsets = [0, 32], sizes = [16, 32], strides = [1, 1]} : vector<16x128xf32> to vector<16x32xf32>
    %84 = vector.extract_strided_slice %81 {offsets = [0, 64], sizes = [16, 32], strides = [1, 1]} : vector<16x128xf32> to vector<16x32xf32>
    %85 = vector.extract_strided_slice %81 {offsets = [0, 96], sizes = [16, 32], strides = [1, 1]} : vector<16x128xf32> to vector<16x32xf32>
    %86 = arith.negf %85 : vector<16x32xf32>
    %87 = math.exp %86 : vector<16x32xf32>
    %cst_40 = arith.constant 1.000000e+00 : f32
    %88 = vector.broadcast %cst_40 : f32 to vector<16x32xf32>
    %89 = arith.addf %88, %87 : vector<16x32xf32>
    %90 = arith.divf %88, %89 : vector<16x32xf32>
    %91 = arith.mulf %85, %90 : vector<16x32xf32>
    %c1_41 = arith.constant 1 : index
    %c0_42 = arith.constant 0 : index
    %92 = vector.load %arg9[%c1_41, %c0_42] : memref<6x32xf32, #tpu.memory_space<vmem>>, vector<1x32xf32>
    %93 = vector.broadcast %92 : vector<1x32xf32> to vector<16x32xf32>
    %94 = arith.addf %93, %70 : vector<16x32xf32>
    %95 = arith.mulf %58, %94 : vector<16x32xf32>
    %96 = arith.addf %48, %95 : vector<16x32xf32>
    %97 = arith.truncf %96 : vector<16x32xf32> to vector<16x32xbf16>
    %c0_43 = arith.constant 0 : index
    %c0_44 = arith.constant 0 : index
    %98 = vector.load %arg14[%c0_43, %c0_44] : memref<32x64xbf16, #tpu.memory_space<vmem>>, vector<32x64xbf16>
    %cst_45 = arith.constant dense<0.000000e+00> : vector<16x64xf32>
    %99 = tpu.matmul %97, %98, %cst_45 {dimension_numbers = #tpu.dot_dimension_numbers<[1], [0], [0], [1], [0, 0, 1, 1], [], []>} : vector<16x32xbf16>, vector<32x64xbf16>, vector<16x64xf32> -> vector<16x64xf32>
    %100 = math.tanh %99 : vector<16x64xf32>
    %101 = arith.truncf %100 : vector<16x64xf32> to vector<16x64xbf16>
    %c0_46 = arith.constant 0 : index
    %c0_47 = arith.constant 0 : index
    %102 = vector.load %arg15[%c0_46, %c0_47] : memref<64x32xbf16, #tpu.memory_space<vmem>>, vector<64x32xbf16>
    %cst_48 = arith.constant dense<0.000000e+00> : vector<16x32xf32>
    %103 = tpu.matmul %101, %102, %cst_48 {dimension_numbers = #tpu.dot_dimension_numbers<[1], [0], [0], [1], [0, 0, 1, 1], [], []>} : vector<16x64xbf16>, vector<64x32xbf16>, vector<16x32xf32> -> vector<16x32xf32>
    %c0_49 = arith.constant 0 : index
    %c0_50 = arith.constant 0 : index
    %104 = vector.load %arg13[%c0_49, %c0_50] : memref<1x32xf32, #tpu.memory_space<vmem>>, vector<1x32xf32>
    %105 = vector.broadcast %104 : vector<1x32xf32> to vector<16x32xf32>
    %106 = arith.addf %105, %103 : vector<16x32xf32>
    %107 = math.exp %106 : vector<16x32xf32>
    %cst_51 = arith.constant 0.000000e+00 : f32
    %108 = vector.broadcast %cst_51 : f32 to vector<16x32xf32>
    %109 = arith.subf %108, %107 : vector<16x32xf32>
    %c0_52 = arith.constant 0 : index
    %c0_53 = arith.constant 0 : index
    %c0_54 = arith.constant 0 : index
    %110 = vector.load %arg5[%c0_52, %c0_53, %c0_54] : memref<2x16x16xf32, #tpu.memory_space<vmem>>, vector<1x16x16xf32>
    %111 = vector.shape_cast %110 : vector<1x16x16xf32> to vector<16x16xf32>
    %cst_55 = arith.constant dense<0.000000e+00> : vector<16x32xf32>
    %112 = tpu.matmul %111, %109, %cst_55 {dimension_numbers = #tpu.dot_dimension_numbers<[1], [0], [0], [1], [0, 0, 1, 1], [], []>} : vector<16x16xf32>, vector<16x32xf32>, vector<16x32xf32> -> vector<16x32xf32>
    %113 = arith.subf %112, %109 : vector<16x32xf32>
    %c1_56 = arith.constant 1 : index
    %c0_57 = arith.constant 0 : index
    %c0_58 = arith.constant 0 : index
    %114 = vector.load %arg5[%c1_56, %c0_57, %c0_58] : memref<2x16x16xf32, #tpu.memory_space<vmem>>, vector<1x16x16xf32>
    %115 = vector.shape_cast %114 : vector<1x16x16xf32> to vector<16x16xf32>
    %cst_59 = arith.constant dense<0.000000e+00> : vector<16x32xf32>
    %116 = tpu.matmul %115, %109, %cst_59 {dimension_numbers = #tpu.dot_dimension_numbers<[1], [0], [0], [1], [0, 0, 1, 1], [], []>} : vector<16x16xf32>, vector<16x32xf32>, vector<16x32xf32> -> vector<16x32xf32>
    %117 = math.exp %113 : vector<16x32xf32>
    %118 = arith.mulf %82, %117 : vector<16x32xf32>
    %cst_60 = arith.constant 0.000000e+00 : f32
    %119 = vector.broadcast %cst_60 : f32 to vector<16x32xf32>
    %120 = arith.subf %119, %112 : vector<16x32xf32>
    %121 = math.exp %120 : vector<16x32xf32>
    %122 = arith.mulf %83, %121 : vector<16x32xf32>
    %123 = arith.subf %116, %112 : vector<16x32xf32>
    %124 = math.exp %123 : vector<16x32xf32>
    %125 = arith.mulf %83, %124 : vector<16x32xf32>
    %126 = math.exp %116 : vector<16x32xf32>
    %127 = arith.mulf %82, %83 : vector<16x32xf32>
    %c0_61 = arith.constant 0 : index
    %c0_62 = arith.constant 0 : index
    %128 = vector.load %arg16[%c0_61, %c0_62] : memref<1x32xf32, #tpu.memory_space<vmem>>, vector<1x32xf32>
    %129 = vector.broadcast %128 : vector<1x32xf32> to vector<16x32xf32>
    %130 = arith.mulf %127, %129 : vector<16x32xf32>
    %c0_63 = arith.constant 0 : index
    %c0_64 = arith.constant 0 : index
    %c0_65 = arith.constant 0 : index
    %131 = vector.load %arg6[%c0_63, %c0_64, %c0_65] : memref<2x8x8xf32, #tpu.memory_space<vmem>>, vector<1x8x8xf32>
    %132 = vector.shape_cast %131 : vector<1x8x8xf32> to vector<8x8xf32>
    %c1_66 = arith.constant 1 : index
    %c0_67 = arith.constant 0 : index
    %c0_68 = arith.constant 0 : index
    %133 = vector.load %arg6[%c1_66, %c0_67, %c0_68] : memref<2x8x8xf32, #tpu.memory_space<vmem>>, vector<1x8x8xf32>
    %134 = vector.shape_cast %133 : vector<1x8x8xf32> to vector<8x8xf32>
    %c0_69 = arith.constant 0 : index
    %c0_70 = arith.constant 0 : index
    %c0_71 = arith.constant 0 : index
    %c0_72 = arith.constant 0 : index
    %135 = vector.load %arg3[%c0_69, %c0_70, %c0_71, %c0_72] : memref<2x2x16x16xf32, #tpu.memory_space<vmem>>, vector<1x2x16x16xf32>
    %136 = vector.shape_cast %135 : vector<1x2x16x16xf32> to vector<2x16x16xf32>
    %137 = vector.extract_strided_slice %118 {offsets = [0, 0], sizes = [8, 16], strides = [1, 1]} : vector<16x32xf32> to vector<8x16xf32>
    %138 = vector.extract_strided_slice %122 {offsets = [0, 0], sizes = [8, 16], strides = [1, 1]} : vector<16x32xf32> to vector<8x16xf32>
    %139 = vector.extract_strided_slice %84 {offsets = [0, 0], sizes = [8, 16], strides = [1, 1]} : vector<16x32xf32> to vector<8x16xf32>
    %140 = vector.extract_strided_slice %125 {offsets = [0, 0], sizes = [8, 16], strides = [1, 1]} : vector<16x32xf32> to vector<8x16xf32>
    %141 = vector.extract_strided_slice %136 {offsets = [0, 0, 0], sizes = [1, 16, 16], strides = [1, 1, 1]} : vector<2x16x16xf32> to vector<1x16x16xf32>
    %142 = vector.shape_cast %141 : vector<1x16x16xf32> to vector<16x16xf32>
    "tpu.trace_start"() <{level = 10 : i32, message = "tk,sk->ts"}> : () -> ()
    %cst_73 = arith.constant dense<0.000000e+00> : vector<8x8xf32>
    %143 = tpu.matmul %137, %138, %cst_73 {dimension_numbers = #tpu.dot_dimension_numbers<[1], [1], [0], [0], [0, 0, 1, 0], [], []>} : vector<8x16xf32>, vector<8x16xf32>, vector<8x8xf32> -> vector<8x8xf32>
    "tpu.trace_stop"() : () -> ()
    %144 = vector.extract_strided_slice %130 {offsets = [0, 0], sizes = [8, 16], strides = [1, 1]} : vector<16x32xf32> to vector<8x16xf32>
    %cst_74 = arith.constant dense<0.000000e+00> : vector<8xf32>
    %145 = vector.multi_reduction <add>, %144, %cst_74 [1] : vector<8x16xf32> to vector<8xf32>
    %146 = vector.shape_cast %145 : vector<8xf32> to vector<8x1xf32>
    %147 = arith.mulf %143, %132 : vector<8x8xf32>
    %148 = vector.broadcast %146 : vector<8x1xf32> to vector<8x8xf32>
    %149 = arith.mulf %148, %134 : vector<8x8xf32>
    %150 = arith.addf %147, %149 : vector<8x8xf32>
    %cst_75 = arith.constant dense<0.000000e+00> : vector<8x16xf32>
    %151 = tpu.matmul %150, %139, %cst_75 {dimension_numbers = #tpu.dot_dimension_numbers<[1], [0], [0], [1], [0, 0, 1, 1], [], []>} : vector<8x8xf32>, vector<8x16xf32>, vector<8x16xf32> -> vector<8x16xf32>
    %cst_76 = arith.constant dense<0.000000e+00> : vector<8x16xf32>
    %152 = tpu.matmul %137, %142, %cst_76 {dimension_numbers = #tpu.dot_dimension_numbers<[1], [0], [0], [1], [0, 0, 1, 1], [], []>} : vector<8x16xf32>, vector<16x16xf32>, vector<8x16xf32> -> vector<8x16xf32>
    %153 = arith.addf %151, %152 : vector<8x16xf32>
    %154 = vector.extract_strided_slice %126 {offsets = [0, 0], sizes = [1, 16], strides = [1, 1]} : vector<16x32xf32> to vector<1x16xf32>
    %155 = tpu.transpose %154, [1, 0] : vector<1x16xf32> -> vector<16x1xf32>
    %156 = vector.broadcast %155 : vector<16x1xf32> to vector<16x16xf32>
    %157 = arith.mulf %156, %142 : vector<16x16xf32>
    %158 = tpu.transpose %140, [1, 0] : vector<8x16xf32> -> vector<16x8xf32>
    %cst_77 = arith.constant dense<0.000000e+00> : vector<16x16xf32>
    %159 = tpu.matmul %158, %139, %cst_77 {dimension_numbers = #tpu.dot_dimension_numbers<[1], [0], [0], [1], [0, 0, 1, 1], [], []>} : vector<16x8xf32>, vector<8x16xf32>, vector<16x16xf32> -> vector<16x16xf32>
    %160 = arith.addf %157, %159 : vector<16x16xf32>
    %161 = vector.shape_cast %160 : vector<16x16xf32> to vector<1x16x16xf32>
    %cst_78 = arith.constant dense<0.000000e+00> : vector<8xf32>
    %162 = vector.multi_reduction <add>, %153, %cst_78 [1] : vector<8x16xf32> to vector<8xf32>
    %163 = vector.shape_cast %162 : vector<8xf32> to vector<8x1xf32>
    %cst_79 = arith.constant 1.600000e+01 : f32
    %164 = vector.broadcast %cst_79 : f32 to vector<8x1xf32>
    %165 = arith.divf %163, %164 : vector<8x1xf32>
    %166 = vector.broadcast %165 : vector<8x1xf32> to vector<8x16xf32>
    %167 = arith.subf %153, %166 : vector<8x16xf32>
    %168 = arith.mulf %167, %167 : vector<8x16xf32>
    %cst_80 = arith.constant dense<0.000000e+00> : vector<8xf32>
    %169 = vector.multi_reduction <add>, %168, %cst_80 [1] : vector<8x16xf32> to vector<8xf32>
    %170 = vector.shape_cast %169 : vector<8xf32> to vector<8x1xf32>
    %cst_81 = arith.constant 1.600000e+01 : f32
    %171 = vector.broadcast %cst_81 : f32 to vector<8x1xf32>
    %172 = arith.divf %170, %171 : vector<8x1xf32>
    %cst_82 = arith.constant 6.400000e-04 : f32
    %173 = vector.broadcast %cst_82 : f32 to vector<8x1xf32>
    %174 = arith.addf %172, %173 : vector<8x1xf32>
    %175 = math.rsqrt %174 : vector<8x1xf32>
    %176 = vector.broadcast %175 : vector<8x1xf32> to vector<8x16xf32>
    %177 = arith.mulf %167, %176 : vector<8x16xf32>
    %178 = vector.extract_strided_slice %118 {offsets = [0, 16], sizes = [8, 16], strides = [1, 1]} : vector<16x32xf32> to vector<8x16xf32>
    %179 = vector.extract_strided_slice %122 {offsets = [0, 16], sizes = [8, 16], strides = [1, 1]} : vector<16x32xf32> to vector<8x16xf32>
    %180 = vector.extract_strided_slice %84 {offsets = [0, 16], sizes = [8, 16], strides = [1, 1]} : vector<16x32xf32> to vector<8x16xf32>
    %181 = vector.extract_strided_slice %125 {offsets = [0, 16], sizes = [8, 16], strides = [1, 1]} : vector<16x32xf32> to vector<8x16xf32>
    %182 = vector.extract_strided_slice %136 {offsets = [1, 0, 0], sizes = [1, 16, 16], strides = [1, 1, 1]} : vector<2x16x16xf32> to vector<1x16x16xf32>
    %183 = vector.shape_cast %182 : vector<1x16x16xf32> to vector<16x16xf32>
    "tpu.trace_start"() <{level = 10 : i32, message = "tk,sk->ts"}> : () -> ()
    %cst_83 = arith.constant dense<0.000000e+00> : vector<8x8xf32>
    %184 = tpu.matmul %178, %179, %cst_83 {dimension_numbers = #tpu.dot_dimension_numbers<[1], [1], [0], [0], [0, 0, 1, 0], [], []>} : vector<8x16xf32>, vector<8x16xf32>, vector<8x8xf32> -> vector<8x8xf32>
    "tpu.trace_stop"() : () -> ()
    %185 = vector.extract_strided_slice %130 {offsets = [0, 16], sizes = [8, 16], strides = [1, 1]} : vector<16x32xf32> to vector<8x16xf32>
    %cst_84 = arith.constant dense<0.000000e+00> : vector<8xf32>
    %186 = vector.multi_reduction <add>, %185, %cst_84 [1] : vector<8x16xf32> to vector<8xf32>
    %187 = vector.shape_cast %186 : vector<8xf32> to vector<8x1xf32>
    %188 = arith.mulf %184, %132 : vector<8x8xf32>
    %189 = vector.broadcast %187 : vector<8x1xf32> to vector<8x8xf32>
    %190 = arith.mulf %189, %134 : vector<8x8xf32>
    %191 = arith.addf %188, %190 : vector<8x8xf32>
    %cst_85 = arith.constant dense<0.000000e+00> : vector<8x16xf32>
    %192 = tpu.matmul %191, %180, %cst_85 {dimension_numbers = #tpu.dot_dimension_numbers<[1], [0], [0], [1], [0, 0, 1, 1], [], []>} : vector<8x8xf32>, vector<8x16xf32>, vector<8x16xf32> -> vector<8x16xf32>
    %cst_86 = arith.constant dense<0.000000e+00> : vector<8x16xf32>
    %193 = tpu.matmul %178, %183, %cst_86 {dimension_numbers = #tpu.dot_dimension_numbers<[1], [0], [0], [1], [0, 0, 1, 1], [], []>} : vector<8x16xf32>, vector<16x16xf32>, vector<8x16xf32> -> vector<8x16xf32>
    %194 = arith.addf %192, %193 : vector<8x16xf32>
    %195 = vector.extract_strided_slice %126 {offsets = [0, 16], sizes = [1, 16], strides = [1, 1]} : vector<16x32xf32> to vector<1x16xf32>
    %196 = tpu.transpose %195, [1, 0] : vector<1x16xf32> -> vector<16x1xf32>
    %197 = vector.broadcast %196 : vector<16x1xf32> to vector<16x16xf32>
    %198 = arith.mulf %197, %183 : vector<16x16xf32>
    %199 = tpu.transpose %181, [1, 0] : vector<8x16xf32> -> vector<16x8xf32>
    %cst_87 = arith.constant dense<0.000000e+00> : vector<16x16xf32>
    %200 = tpu.matmul %199, %180, %cst_87 {dimension_numbers = #tpu.dot_dimension_numbers<[1], [0], [0], [1], [0, 0, 1, 1], [], []>} : vector<16x8xf32>, vector<8x16xf32>, vector<16x16xf32> -> vector<16x16xf32>
    %201 = arith.addf %198, %200 : vector<16x16xf32>
    %202 = vector.shape_cast %201 : vector<16x16xf32> to vector<1x16x16xf32>
    %cst_88 = arith.constant dense<0.000000e+00> : vector<8xf32>
    %203 = vector.multi_reduction <add>, %194, %cst_88 [1] : vector<8x16xf32> to vector<8xf32>
    %204 = vector.shape_cast %203 : vector<8xf32> to vector<8x1xf32>
    %cst_89 = arith.constant 1.600000e+01 : f32
    %205 = vector.broadcast %cst_89 : f32 to vector<8x1xf32>
    %206 = arith.divf %204, %205 : vector<8x1xf32>
    %207 = vector.broadcast %206 : vector<8x1xf32> to vector<8x16xf32>
    %208 = arith.subf %194, %207 : vector<8x16xf32>
    %209 = arith.mulf %208, %208 : vector<8x16xf32>
    %cst_90 = arith.constant dense<0.000000e+00> : vector<8xf32>
    %210 = vector.multi_reduction <add>, %209, %cst_90 [1] : vector<8x16xf32> to vector<8xf32>
    %211 = vector.shape_cast %210 : vector<8xf32> to vector<8x1xf32>
    %cst_91 = arith.constant 1.600000e+01 : f32
    %212 = vector.broadcast %cst_91 : f32 to vector<8x1xf32>
    %213 = arith.divf %211, %212 : vector<8x1xf32>
    %cst_92 = arith.constant 6.400000e-04 : f32
    %214 = vector.broadcast %cst_92 : f32 to vector<8x1xf32>
    %215 = arith.addf %213, %214 : vector<8x1xf32>
    %216 = math.rsqrt %215 : vector<8x1xf32>
    %217 = vector.broadcast %216 : vector<8x1xf32> to vector<8x16xf32>
    %218 = arith.mulf %208, %217 : vector<8x16xf32>
    %219 = tpu.concatenate %161, %202 in 0 : vector<1x16x16xf32>, vector<1x16x16xf32> -> vector<2x16x16xf32>
    %c0_93 = arith.constant 0 : index
    %c0_94 = arith.constant 0 : index
    %c0_95 = arith.constant 0 : index
    %c0_96 = arith.constant 0 : index
    %220 = vector.load %arg25[%c0_93, %c0_94, %c0_95, %c0_96] : memref<2x2x16x16xf32, #tpu.memory_space<vmem>>, vector<1x2x16x16xf32>
    %221 = vector.shape_cast %220 : vector<1x2x16x16xf32> to vector<2x16x16xf32>
    %222 = vector.shape_cast %219 : vector<2x16x16xf32> to vector<1x2x16x16xf32>
    tpu.vector_store %arg25[%c0_93, %c0_94, %c0_95, %c0_96], %222 {strides = array<i32>} : memref<2x2x16x16xf32, #tpu.memory_space<vmem>>, vector<1x2x16x16xf32>,
    %223 = tpu.concatenate %177, %218 in 1 : vector<8x16xf32>, vector<8x16xf32> -> vector<8x32xf32>
    %c1_97 = arith.constant 1 : index
    %c0_98 = arith.constant 0 : index
    %c0_99 = arith.constant 0 : index
    %c0_100 = arith.constant 0 : index
    %224 = vector.load %arg3[%c1_97, %c0_98, %c0_99, %c0_100] : memref<2x2x16x16xf32, #tpu.memory_space<vmem>>, vector<1x2x16x16xf32>
    %225 = vector.shape_cast %224 : vector<1x2x16x16xf32> to vector<2x16x16xf32>
    %226 = vector.extract_strided_slice %118 {offsets = [8, 0], sizes = [8, 16], strides = [1, 1]} : vector<16x32xf32> to vector<8x16xf32>
    %227 = vector.extract_strided_slice %122 {offsets = [8, 0], sizes = [8, 16], strides = [1, 1]} : vector<16x32xf32> to vector<8x16xf32>
    %228 = vector.extract_strided_slice %84 {offsets = [8, 0], sizes = [8, 16], strides = [1, 1]} : vector<16x32xf32> to vector<8x16xf32>
    %229 = vector.extract_strided_slice %125 {offsets = [8, 0], sizes = [8, 16], strides = [1, 1]} : vector<16x32xf32> to vector<8x16xf32>
    %230 = vector.extract_strided_slice %225 {offsets = [0, 0, 0], sizes = [1, 16, 16], strides = [1, 1, 1]} : vector<2x16x16xf32> to vector<1x16x16xf32>
    %231 = vector.shape_cast %230 : vector<1x16x16xf32> to vector<16x16xf32>
    "tpu.trace_start"() <{level = 10 : i32, message = "tk,sk->ts"}> : () -> ()
    %cst_101 = arith.constant dense<0.000000e+00> : vector<8x8xf32>
    %232 = tpu.matmul %226, %227, %cst_101 {dimension_numbers = #tpu.dot_dimension_numbers<[1], [1], [0], [0], [0, 0, 1, 0], [], []>} : vector<8x16xf32>, vector<8x16xf32>, vector<8x8xf32> -> vector<8x8xf32>
    "tpu.trace_stop"() : () -> ()
    %233 = vector.extract_strided_slice %130 {offsets = [8, 0], sizes = [8, 16], strides = [1, 1]} : vector<16x32xf32> to vector<8x16xf32>
    %cst_102 = arith.constant dense<0.000000e+00> : vector<8xf32>
    %234 = vector.multi_reduction <add>, %233, %cst_102 [1] : vector<8x16xf32> to vector<8xf32>
    %235 = vector.shape_cast %234 : vector<8xf32> to vector<8x1xf32>
    %236 = arith.mulf %232, %132 : vector<8x8xf32>
    %237 = vector.broadcast %235 : vector<8x1xf32> to vector<8x8xf32>
    %238 = arith.mulf %237, %134 : vector<8x8xf32>
    %239 = arith.addf %236, %238 : vector<8x8xf32>
    %cst_103 = arith.constant dense<0.000000e+00> : vector<8x16xf32>
    %240 = tpu.matmul %239, %228, %cst_103 {dimension_numbers = #tpu.dot_dimension_numbers<[1], [0], [0], [1], [0, 0, 1, 1], [], []>} : vector<8x8xf32>, vector<8x16xf32>, vector<8x16xf32> -> vector<8x16xf32>
    %cst_104 = arith.constant dense<0.000000e+00> : vector<8x16xf32>
    %241 = tpu.matmul %226, %231, %cst_104 {dimension_numbers = #tpu.dot_dimension_numbers<[1], [0], [0], [1], [0, 0, 1, 1], [], []>} : vector<8x16xf32>, vector<16x16xf32>, vector<8x16xf32> -> vector<8x16xf32>
    %242 = arith.addf %240, %241 : vector<8x16xf32>
    %243 = vector.extract_strided_slice %126 {offsets = [8, 0], sizes = [1, 16], strides = [1, 1]} : vector<16x32xf32> to vector<1x16xf32>
    %244 = tpu.transpose %243, [1, 0] : vector<1x16xf32> -> vector<16x1xf32>
    %245 = vector.broadcast %244 : vector<16x1xf32> to vector<16x16xf32>
    %246 = arith.mulf %245, %231 : vector<16x16xf32>
    %247 = tpu.transpose %229, [1, 0] : vector<8x16xf32> -> vector<16x8xf32>
    %cst_105 = arith.constant dense<0.000000e+00> : vector<16x16xf32>
    %248 = tpu.matmul %247, %228, %cst_105 {dimension_numbers = #tpu.dot_dimension_numbers<[1], [0], [0], [1], [0, 0, 1, 1], [], []>} : vector<16x8xf32>, vector<8x16xf32>, vector<16x16xf32> -> vector<16x16xf32>
    %249 = arith.addf %246, %248 : vector<16x16xf32>
    %250 = vector.shape_cast %249 : vector<16x16xf32> to vector<1x16x16xf32>
    %cst_106 = arith.constant dense<0.000000e+00> : vector<8xf32>
    %251 = vector.multi_reduction <add>, %242, %cst_106 [1] : vector<8x16xf32> to vector<8xf32>
    %252 = vector.shape_cast %251 : vector<8xf32> to vector<8x1xf32>
    %cst_107 = arith.constant 1.600000e+01 : f32
    %253 = vector.broadcast %cst_107 : f32 to vector<8x1xf32>
    %254 = arith.divf %252, %253 : vector<8x1xf32>
    %255 = vector.broadcast %254 : vector<8x1xf32> to vector<8x16xf32>
    %256 = arith.subf %242, %255 : vector<8x16xf32>
    %257 = arith.mulf %256, %256 : vector<8x16xf32>
    %cst_108 = arith.constant dense<0.000000e+00> : vector<8xf32>
    %258 = vector.multi_reduction <add>, %257, %cst_108 [1] : vector<8x16xf32> to vector<8xf32>
    %259 = vector.shape_cast %258 : vector<8xf32> to vector<8x1xf32>
    %cst_109 = arith.constant 1.600000e+01 : f32
    %260 = vector.broadcast %cst_109 : f32 to vector<8x1xf32>
    %261 = arith.divf %259, %260 : vector<8x1xf32>
    %cst_110 = arith.constant 6.400000e-04 : f32
    %262 = vector.broadcast %cst_110 : f32 to vector<8x1xf32>
    %263 = arith.addf %261, %262 : vector<8x1xf32>
    %264 = math.rsqrt %263 : vector<8x1xf32>
    %265 = vector.broadcast %264 : vector<8x1xf32> to vector<8x16xf32>
    %266 = arith.mulf %256, %265 : vector<8x16xf32>
    %267 = vector.extract_strided_slice %118 {offsets = [8, 16], sizes = [8, 16], strides = [1, 1]} : vector<16x32xf32> to vector<8x16xf32>
    %268 = vector.extract_strided_slice %122 {offsets = [8, 16], sizes = [8, 16], strides = [1, 1]} : vector<16x32xf32> to vector<8x16xf32>
    %269 = vector.extract_strided_slice %84 {offsets = [8, 16], sizes = [8, 16], strides = [1, 1]} : vector<16x32xf32> to vector<8x16xf32>
    %270 = vector.extract_strided_slice %125 {offsets = [8, 16], sizes = [8, 16], strides = [1, 1]} : vector<16x32xf32> to vector<8x16xf32>
    %271 = vector.extract_strided_slice %225 {offsets = [1, 0, 0], sizes = [1, 16, 16], strides = [1, 1, 1]} : vector<2x16x16xf32> to vector<1x16x16xf32>
    %272 = vector.shape_cast %271 : vector<1x16x16xf32> to vector<16x16xf32>
    "tpu.trace_start"() <{level = 10 : i32, message = "tk,sk->ts"}> : () -> ()
    %cst_111 = arith.constant dense<0.000000e+00> : vector<8x8xf32>
    %273 = tpu.matmul %267, %268, %cst_111 {dimension_numbers = #tpu.dot_dimension_numbers<[1], [1], [0], [0], [0, 0, 1, 0], [], []>} : vector<8x16xf32>, vector<8x16xf32>, vector<8x8xf32> -> vector<8x8xf32>
    "tpu.trace_stop"() : () -> ()
    %274 = vector.extract_strided_slice %130 {offsets = [8, 16], sizes = [8, 16], strides = [1, 1]} : vector<16x32xf32> to vector<8x16xf32>
    %cst_112 = arith.constant dense<0.000000e+00> : vector<8xf32>
    %275 = vector.multi_reduction <add>, %274, %cst_112 [1] : vector<8x16xf32> to vector<8xf32>
    %276 = vector.shape_cast %275 : vector<8xf32> to vector<8x1xf32>
    %277 = arith.mulf %273, %132 : vector<8x8xf32>
    %278 = vector.broadcast %276 : vector<8x1xf32> to vector<8x8xf32>
    %279 = arith.mulf %278, %134 : vector<8x8xf32>
    %280 = arith.addf %277, %279 : vector<8x8xf32>
    %cst_113 = arith.constant dense<0.000000e+00> : vector<8x16xf32>
    %281 = tpu.matmul %280, %269, %cst_113 {dimension_numbers = #tpu.dot_dimension_numbers<[1], [0], [0], [1], [0, 0, 1, 1], [], []>} : vector<8x8xf32>, vector<8x16xf32>, vector<8x16xf32> -> vector<8x16xf32>
    %cst_114 = arith.constant dense<0.000000e+00> : vector<8x16xf32>
    %282 = tpu.matmul %267, %272, %cst_114 {dimension_numbers = #tpu.dot_dimension_numbers<[1], [0], [0], [1], [0, 0, 1, 1], [], []>} : vector<8x16xf32>, vector<16x16xf32>, vector<8x16xf32> -> vector<8x16xf32>
    %283 = arith.addf %281, %282 : vector<8x16xf32>
    %284 = vector.extract_strided_slice %126 {offsets = [8, 16], sizes = [1, 16], strides = [1, 1]} : vector<16x32xf32> to vector<1x16xf32>
    %285 = tpu.transpose %284, [1, 0] : vector<1x16xf32> -> vector<16x1xf32>
    %286 = vector.broadcast %285 : vector<16x1xf32> to vector<16x16xf32>
    %287 = arith.mulf %286, %272 : vector<16x16xf32>
    %288 = tpu.transpose %270, [1, 0] : vector<8x16xf32> -> vector<16x8xf32>
    %cst_115 = arith.constant dense<0.000000e+00> : vector<16x16xf32>
    %289 = tpu.matmul %288, %269, %cst_115 {dimension_numbers = #tpu.dot_dimension_numbers<[1], [0], [0], [1], [0, 0, 1, 1], [], []>} : vector<16x8xf32>, vector<8x16xf32>, vector<16x16xf32> -> vector<16x16xf32>
    %290 = arith.addf %287, %289 : vector<16x16xf32>
    %291 = vector.shape_cast %290 : vector<16x16xf32> to vector<1x16x16xf32>
    %cst_116 = arith.constant dense<0.000000e+00> : vector<8xf32>
    %292 = vector.multi_reduction <add>, %283, %cst_116 [1] : vector<8x16xf32> to vector<8xf32>
    %293 = vector.shape_cast %292 : vector<8xf32> to vector<8x1xf32>
    %cst_117 = arith.constant 1.600000e+01 : f32
    %294 = vector.broadcast %cst_117 : f32 to vector<8x1xf32>
    %295 = arith.divf %293, %294 : vector<8x1xf32>
    %296 = vector.broadcast %295 : vector<8x1xf32> to vector<8x16xf32>
    %297 = arith.subf %283, %296 : vector<8x16xf32>
    %298 = arith.mulf %297, %297 : vector<8x16xf32>
    %cst_118 = arith.constant dense<0.000000e+00> : vector<8xf32>
    %299 = vector.multi_reduction <add>, %298, %cst_118 [1] : vector<8x16xf32> to vector<8xf32>
    %300 = vector.shape_cast %299 : vector<8xf32> to vector<8x1xf32>
    %cst_119 = arith.constant 1.600000e+01 : f32
    %301 = vector.broadcast %cst_119 : f32 to vector<8x1xf32>
    %302 = arith.divf %300, %301 : vector<8x1xf32>
    %cst_120 = arith.constant 6.400000e-04 : f32
    %303 = vector.broadcast %cst_120 : f32 to vector<8x1xf32>
    %304 = arith.addf %302, %303 : vector<8x1xf32>
    %305 = math.rsqrt %304 : vector<8x1xf32>
    %306 = vector.broadcast %305 : vector<8x1xf32> to vector<8x16xf32>
    %307 = arith.mulf %297, %306 : vector<8x16xf32>
    %308 = tpu.concatenate %250, %291 in 0 : vector<1x16x16xf32>, vector<1x16x16xf32> -> vector<2x16x16xf32>
    %c1_121 = arith.constant 1 : index
    %c0_122 = arith.constant 0 : index
    %c0_123 = arith.constant 0 : index
    %c0_124 = arith.constant 0 : index
    %309 = vector.load %arg25[%c1_121, %c0_122, %c0_123, %c0_124] : memref<2x2x16x16xf32, #tpu.memory_space<vmem>>, vector<1x2x16x16xf32>
    %310 = vector.shape_cast %309 : vector<1x2x16x16xf32> to vector<2x16x16xf32>
    %311 = vector.shape_cast %308 : vector<2x16x16xf32> to vector<1x2x16x16xf32>
    tpu.vector_store %arg25[%c1_121, %c0_122, %c0_123, %c0_124], %311 {strides = array<i32>} : memref<2x2x16x16xf32, #tpu.memory_space<vmem>>, vector<1x2x16x16xf32>,
    %312 = tpu.concatenate %266, %307 in 1 : vector<8x16xf32>, vector<8x16xf32> -> vector<8x32xf32>
    %313 = tpu.concatenate %223, %312 in 0 : vector<8x32xf32>, vector<8x32xf32> -> vector<16x32xf32>
    %c3 = arith.constant 3 : index
    %c0_125 = arith.constant 0 : index
    %314 = vector.load %arg7[%c3, %c0_125] : memref<4x32xf32, #tpu.memory_space<vmem>>, vector<1x32xf32>
    %315 = vector.broadcast %314 : vector<1x32xf32> to vector<16x32xf32>
    %316 = arith.mulf %313, %315 : vector<16x32xf32>
    %c3_126 = arith.constant 3 : index
    %c0_127 = arith.constant 0 : index
    %317 = vector.load %arg8[%c3_126, %c0_127] : memref<4x32xf32, #tpu.memory_space<vmem>>, vector<1x32xf32>
    %318 = vector.broadcast %317 : vector<1x32xf32> to vector<16x32xf32>
    %319 = arith.addf %316, %318 : vector<16x32xf32>
    %320 = arith.mulf %319, %91 : vector<16x32xf32>
    %321 = arith.truncf %320 : vector<16x32xf32> to vector<16x32xbf16>
    %c0_128 = arith.constant 0 : index
    %c0_129 = arith.constant 0 : index
    %322 = vector.load %arg18[%c0_128, %c0_129] : memref<32x32xbf16, #tpu.memory_space<vmem>>, vector<32x32xbf16>
    %cst_130 = arith.constant dense<0.000000e+00> : vector<16x32xf32>
    %323 = tpu.matmul %321, %322, %cst_130 {dimension_numbers = #tpu.dot_dimension_numbers<[1], [0], [0], [1], [0, 0, 1, 1], [], []>} : vector<16x32xbf16>, vector<32x32xbf16>, vector<16x32xf32> -> vector<16x32xf32>
    %324 = arith.addf %26, %323 : vector<16x32xf32>
    %c2 = arith.constant 2 : index
    %c0_131 = arith.constant 0 : index
    %325 = vector.load %arg7[%c2, %c0_131] : memref<4x32xf32, #tpu.memory_space<vmem>>, vector<1x32xf32>
    %c2_132 = arith.constant 2 : index
    %c0_133 = arith.constant 0 : index
    %326 = vector.load %arg8[%c2_132, %c0_133] : memref<4x32xf32, #tpu.memory_space<vmem>>, vector<1x32xf32>
    %cst_134 = arith.constant dense<0.000000e+00> : vector<16xf32>
    %327 = vector.multi_reduction <add>, %324, %cst_134 [1] : vector<16x32xf32> to vector<16xf32>
    %328 = vector.shape_cast %327 : vector<16xf32> to vector<16x1xf32>
    %cst_135 = arith.constant 3.200000e+01 : f32
    %329 = vector.broadcast %cst_135 : f32 to vector<16x1xf32>
    %330 = arith.divf %328, %329 : vector<16x1xf32>
    %331 = vector.broadcast %330 : vector<16x1xf32> to vector<16x32xf32>
    %332 = arith.subf %324, %331 : vector<16x32xf32>
    %333 = arith.mulf %332, %332 : vector<16x32xf32>
    %cst_136 = arith.constant dense<0.000000e+00> : vector<16xf32>
    %334 = vector.multi_reduction <add>, %333, %cst_136 [1] : vector<16x32xf32> to vector<16xf32>
    %335 = vector.shape_cast %334 : vector<16xf32> to vector<16x1xf32>
    %cst_137 = arith.constant 3.200000e+01 : f32
    %336 = vector.broadcast %cst_137 : f32 to vector<16x1xf32>
    %337 = arith.divf %335, %336 : vector<16x1xf32>
    %cst_138 = arith.constant 9.99999974E-6 : f32
    %338 = vector.broadcast %cst_138 : f32 to vector<16x1xf32>
    %339 = arith.addf %337, %338 : vector<16x1xf32>
    %340 = math.rsqrt %339 : vector<16x1xf32>
    %341 = vector.broadcast %340 : vector<16x1xf32> to vector<16x32xf32>
    %342 = arith.mulf %332, %341 : vector<16x32xf32>
    %343 = vector.broadcast %325 : vector<1x32xf32> to vector<16x32xf32>
    %344 = arith.mulf %342, %343 : vector<16x32xf32>
    %345 = vector.broadcast %326 : vector<1x32xf32> to vector<16x32xf32>
    %346 = arith.addf %344, %345 : vector<16x32xf32>
    %c0_139 = arith.constant 0 : index
    %c0_140 = arith.constant 0 : index
    %c0_141 = arith.constant 0 : index
    %347 = vector.load %arg4[%c0_139, %c0_140, %c0_141] : memref<2x1x32xf32, #tpu.memory_space<vmem>>, vector<1x1x32xf32>
    %348 = vector.shape_cast %347 : vector<1x1x32xf32> to vector<1x32xf32>
    %349 = vector.extract_strided_slice %346 {offsets = [0, 0], sizes = [7, 32], strides = [1, 1]} : vector<16x32xf32> to vector<7x32xf32>
    %350 = tpu.concatenate %348, %349 in 0 : vector<1x32xf32>, vector<7x32xf32> -> vector<8x32xf32>
    %c1_142 = arith.constant 1 : index
    %c0_143 = arith.constant 0 : index
    %c0_144 = arith.constant 0 : index
    %351 = vector.load %arg4[%c1_142, %c0_143, %c0_144] : memref<2x1x32xf32, #tpu.memory_space<vmem>>, vector<1x1x32xf32>
    %352 = vector.shape_cast %351 : vector<1x1x32xf32> to vector<1x32xf32>
    %353 = vector.extract_strided_slice %346 {offsets = [8, 0], sizes = [7, 32], strides = [1, 1]} : vector<16x32xf32> to vector<7x32xf32>
    %354 = tpu.concatenate %352, %353 in 0 : vector<1x32xf32>, vector<7x32xf32> -> vector<8x32xf32>
    %355 = tpu.concatenate %350, %354 in 0 : vector<8x32xf32>, vector<8x32xf32> -> vector<16x32xf32>
    %356 = arith.subf %355, %346 : vector<16x32xf32>
    %c0_145 = arith.constant 0 : index
    %c0_146 = arith.constant 0 : index
    %357 = vector.load %arg19[%c0_145, %c0_146] : memref<2x32xf32, #tpu.memory_space<vmem>>, vector<1x32xf32>
    %358 = vector.broadcast %357 : vector<1x32xf32> to vector<16x32xf32>
    %359 = arith.mulf %356, %358 : vector<16x32xf32>
    %360 = arith.addf %346, %359 : vector<16x32xf32>
    %c1_147 = arith.constant 1 : index
    %c0_148 = arith.constant 0 : index
    %361 = vector.load %arg19[%c1_147, %c0_148] : memref<2x32xf32, #tpu.memory_space<vmem>>, vector<1x32xf32>
    %362 = vector.broadcast %361 : vector<1x32xf32> to vector<16x32xf32>
    %363 = arith.mulf %356, %362 : vector<16x32xf32>
    %364 = arith.addf %346, %363 : vector<16x32xf32>
    %365 = arith.truncf %360 : vector<16x32xf32> to vector<16x32xbf16>
    %c0_149 = arith.constant 0 : index
    %c0_150 = arith.constant 0 : index
    %366 = vector.load %arg20[%c0_149, %c0_150] : memref<32x128xbf16, #tpu.memory_space<vmem>>, vector<32x128xbf16>
    %cst_151 = arith.constant dense<0.000000e+00> : vector<16x128xf32>
    %367 = tpu.matmul %365, %366, %cst_151 {dimension_numbers = #tpu.dot_dimension_numbers<[1], [0], [0], [1], [0, 0, 1, 1], [], []>} : vector<16x32xbf16>, vector<32x128xbf16>, vector<16x128xf32> -> vector<16x128xf32>
    %cst_152 = arith.constant 0.000000e+00 : f32
    %368 = vector.broadcast %cst_152 : f32 to vector<16x128xf32>
    %369 = arith.maximumf %367, %368 : vector<16x128xf32>
    %370 = arith.mulf %369, %369 : vector<16x128xf32>
    %371 = arith.truncf %370 : vector<16x128xf32> to vector<16x128xbf16>
    %c0_153 = arith.constant 0 : index
    %c0_154 = arith.constant 0 : index
    %372 = vector.load %arg21[%c0_153, %c0_154] : memref<128x32xbf16, #tpu.memory_space<vmem>>, vector<128x32xbf16>
    %cst_155 = arith.constant dense<0.000000e+00> : vector<16x32xf32>
    %373 = tpu.matmul %371, %372, %cst_155 {dimension_numbers = #tpu.dot_dimension_numbers<[1], [0], [0], [1], [0, 0, 1, 1], [], []>} : vector<16x128xbf16>, vector<128x32xbf16>, vector<16x32xf32> -> vector<16x32xf32>
    %374 = arith.truncf %364 : vector<16x32xf32> to vector<16x32xbf16>
    %c0_156 = arith.constant 0 : index
    %c0_157 = arith.constant 0 : index
    %375 = vector.load %arg22[%c0_156, %c0_157] : memref<32x32xbf16, #tpu.memory_space<vmem>>, vector<32x32xbf16>
    %cst_158 = arith.constant dense<0.000000e+00> : vector<16x32xf32>
    %376 = tpu.matmul %374, %375, %cst_158 {dimension_numbers = #tpu.dot_dimension_numbers<[1], [0], [0], [1], [0, 0, 1, 1], [], []>} : vector<16x32xbf16>, vector<32x32xbf16>, vector<16x32xf32> -> vector<16x32xf32>
    %377 = arith.negf %376 : vector<16x32xf32>
    %378 = math.exp %377 : vector<16x32xf32>
    %cst_159 = arith.constant 1.000000e+00 : f32
    %379 = vector.broadcast %cst_159 : f32 to vector<16x32xf32>
    %380 = arith.addf %379, %378 : vector<16x32xf32>
    %381 = arith.divf %379, %380 : vector<16x32xf32>
    %382 = arith.mulf %381, %373 : vector<16x32xf32>
    %383 = arith.addf %324, %382 : vector<16x32xf32>
    %384 = vector.extract_strided_slice %383 {offsets = [0, 0], sizes = [8, 32], strides = [1, 1]} : vector<16x32xf32> to vector<8x32xf32>
    %c0_160 = arith.constant 0 : index
    %c0_161 = arith.constant 0 : index
    %c0_162 = arith.constant 0 : index
    %385 = vector.load %arg23[%c0_160, %c0_161, %c0_162] : memref<2x8x32xf32, #tpu.memory_space<vmem>>, vector<1x8x32xf32>
    %386 = vector.shape_cast %385 : vector<1x8x32xf32> to vector<8x32xf32>
    %387 = vector.shape_cast %384 : vector<8x32xf32> to vector<1x8x32xf32>
    tpu.vector_store %arg23[%c0_160, %c0_161, %c0_162], %387 {strides = array<i32>} : memref<2x8x32xf32, #tpu.memory_space<vmem>>, vector<1x8x32xf32>,
    %388 = vector.extract_strided_slice %48 {offsets = [7, 0], sizes = [1, 32], strides = [1, 1]} : vector<16x32xf32> to vector<1x32xf32>
    %c0_163 = arith.constant 0 : index
    %c0_164 = arith.constant 0 : index
    %c0_165 = arith.constant 0 : index
    %389 = vector.load %arg24[%c0_163, %c0_164, %c0_165] : memref<2x1x32xf32, #tpu.memory_space<vmem>>, vector<1x1x32xf32>
    %390 = vector.shape_cast %389 : vector<1x1x32xf32> to vector<1x32xf32>
    %391 = vector.shape_cast %388 : vector<1x32xf32> to vector<1x1x32xf32>
    tpu.vector_store %arg24[%c0_163, %c0_164, %c0_165], %391 {strides = array<i32>} : memref<2x1x32xf32, #tpu.memory_space<vmem>>, vector<1x1x32xf32>,
    %392 = vector.extract_strided_slice %346 {offsets = [7, 0], sizes = [1, 32], strides = [1, 1]} : vector<16x32xf32> to vector<1x32xf32>
    %c0_166 = arith.constant 0 : index
    %c0_167 = arith.constant 0 : index
    %c0_168 = arith.constant 0 : index
    %393 = vector.load %arg26[%c0_166, %c0_167, %c0_168] : memref<2x1x32xf32, #tpu.memory_space<vmem>>, vector<1x1x32xf32>
    %394 = vector.shape_cast %393 : vector<1x1x32xf32> to vector<1x32xf32>
    %395 = vector.shape_cast %392 : vector<1x32xf32> to vector<1x1x32xf32>
    tpu.vector_store %arg26[%c0_166, %c0_167, %c0_168], %395 {strides = array<i32>} : memref<2x1x32xf32, #tpu.memory_space<vmem>>, vector<1x1x32xf32>,
    %396 = vector.extract_strided_slice %383 {offsets = [8, 0], sizes = [8, 32], strides = [1, 1]} : vector<16x32xf32> to vector<8x32xf32>
    %c1_169 = arith.constant 1 : index
    %c0_170 = arith.constant 0 : index
    %c0_171 = arith.constant 0 : index
    %397 = vector.load %arg23[%c1_169, %c0_170, %c0_171] : memref<2x8x32xf32, #tpu.memory_space<vmem>>, vector<1x8x32xf32>
    %398 = vector.shape_cast %397 : vector<1x8x32xf32> to vector<8x32xf32>
    %399 = vector.shape_cast %396 : vector<8x32xf32> to vector<1x8x32xf32>
    tpu.vector_store %arg23[%c1_169, %c0_170, %c0_171], %399 {strides = array<i32>} : memref<2x8x32xf32, #tpu.memory_space<vmem>>, vector<1x8x32xf32>,
    %400 = vector.extract_strided_slice %48 {offsets = [15, 0], sizes = [1, 32], strides = [1, 1]} : vector<16x32xf32> to vector<1x32xf32>
    %c1_172 = arith.constant 1 : index
    %c0_173 = arith.constant 0 : index
    %c0_174 = arith.constant 0 : index
    %401 = vector.load %arg24[%c1_172, %c0_173, %c0_174] : memref<2x1x32xf32, #tpu.memory_space<vmem>>, vector<1x1x32xf32>
    %402 = vector.shape_cast %401 : vector<1x1x32xf32> to vector<1x32xf32>
    %403 = vector.shape_cast %400 : vector<1x32xf32> to vector<1x1x32xf32>
    tpu.vector_store %arg24[%c1_172, %c0_173, %c0_174], %403 {strides = array<i32>} : memref<2x1x32xf32, #tpu.memory_space<vmem>>, vector<1x1x32xf32>,
    %404 = vector.extract_strided_slice %346 {offsets = [15, 0], sizes = [1, 32], strides = [1, 1]} : vector<16x32xf32> to vector<1x32xf32>
    %c1_175 = arith.constant 1 : index
    %c0_176 = arith.constant 0 : index
    %c0_177 = arith.constant 0 : index
    %405 = vector.load %arg26[%c1_175, %c0_176, %c0_177] : memref<2x1x32xf32, #tpu.memory_space<vmem>>, vector<1x1x32xf32>
    %406 = vector.shape_cast %405 : vector<1x1x32xf32> to vector<1x32xf32>
    %407 = vector.shape_cast %404 : vector<1x32xf32> to vector<1x1x32xf32>
    tpu.vector_store %arg26[%c1_175, %c0_176, %c0_177], %407 {strides = array<i32>} : memref<2x1x32xf32, #tpu.memory_space<vmem>>, vector<1x1x32xf32>,
    return
  }
  func.func @transform_0(%arg0: i32) -> (i32, i32, i32) {
    %c0_i32 = arith.constant 0 : i32
    %c0_i32_0 = arith.constant 0 : i32
    %c0_i32_1 = arith.constant 0 : i32
    %c0_i32_2 = arith.constant 0 : i32
    return %c0_i32, %c0_i32_0, %c0_i32_1 : i32, i32, i32
  }
  func.func @transform_1(%arg0: i32) -> (i32, i32, i32) {
    %c0_i32 = arith.constant 0 : i32
    %c0_i32_0 = arith.constant 0 : i32
    %c0_i32_1 = arith.constant 0 : i32
    %c0_i32_2 = arith.constant 0 : i32
    return %c0_i32, %c0_i32_0, %c0_i32_1 : i32, i32, i32
  }
  func.func @transform_2(%arg0: i32) -> (i32, i32, i32, i32) {
    %c0_i32 = arith.constant 0 : i32
    %c0_i32_0 = arith.constant 0 : i32
    %c0_i32_1 = arith.constant 0 : i32
    %c0_i32_2 = arith.constant 0 : i32
    %c0_i32_3 = arith.constant 0 : i32
    return %c0_i32, %c0_i32_0, %c0_i32_1, %c0_i32_2 : i32, i32, i32, i32
  }
  func.func @transform_3(%arg0: i32) -> (i32, i32, i32) {
    %c0_i32 = arith.constant 0 : i32
    %c0_i32_0 = arith.constant 0 : i32
    %c0_i32_1 = arith.constant 0 : i32
    %c0_i32_2 = arith.constant 0 : i32
    return %c0_i32, %c0_i32_0, %c0_i32_1 : i32, i32, i32
  }
  func.func @transform_4(%arg0: i32) -> (i32, i32, i32) {
    %c0_i32 = arith.constant 0 : i32
    %c0_i32_0 = arith.constant 0 : i32
    %c0_i32_1 = arith.constant 0 : i32
    %c0_i32_2 = arith.constant 0 : i32
    return %c0_i32, %c0_i32_0, %c0_i32_1 : i32, i32, i32
  }
  func.func @transform_5(%arg0: i32) -> (i32, i32, i32) {
    %c0_i32 = arith.constant 0 : i32
    %c0_i32_0 = arith.constant 0 : i32
    %c0_i32_1 = arith.constant 0 : i32
    %c0_i32_2 = arith.constant 0 : i32
    return %c0_i32, %c0_i32_0, %c0_i32_1 : i32, i32, i32
  }
  func.func @transform_6(%arg0: i32) -> (i32, i32) {
    %c0_i32 = arith.constant 0 : i32
    %c0_i32_0 = arith.constant 0 : i32
    %c0_i32_1 = arith.constant 0 : i32
    return %c0_i32, %c0_i32_0 : i32, i32
  }
  func.func @transform_7(%arg0: i32) -> (i32, i32) {
    %c0_i32 = arith.constant 0 : i32
    %c0_i32_0 = arith.constant 0 : i32
    %c0_i32_1 = arith.constant 0 : i32
    return %c0_i32, %c0_i32_0 : i32, i32
  }
  func.func @transform_8(%arg0: i32) -> (i32, i32) {
    %c0_i32 = arith.constant 0 : i32
    %c0_i32_0 = arith.constant 0 : i32
    %c0_i32_1 = arith.constant 0 : i32
    return %c0_i32, %c0_i32_0 : i32, i32
  }
  func.func @transform_9(%arg0: i32) -> (i32, i32) {
    %c0_i32 = arith.constant 0 : i32
    %c0_i32_0 = arith.constant 0 : i32
    %c0_i32_1 = arith.constant 0 : i32
    return %c0_i32, %c0_i32_0 : i32, i32
  }
  func.func @transform_10(%arg0: i32) -> (i32, i32) {
    %c0_i32 = arith.constant 0 : i32
    %c0_i32_0 = arith.constant 0 : i32
    %c0_i32_1 = arith.constant 0 : i32
    return %c0_i32, %c0_i32_0 : i32, i32
  }
  func.func @transform_11(%arg0: i32) -> (i32, i32) {
    %c0_i32 = arith.constant 0 : i32
    %c0_i32_0 = arith.constant 0 : i32
    %c0_i32_1 = arith.constant 0 : i32
    return %c0_i32, %c0_i32_0 : i32, i32
  }
  func.func @transform_12(%arg0: i32) -> (i32, i32) {
    %c0_i32 = arith.constant 0 : i32
    %c0_i32_0 = arith.constant 0 : i32
    %c0_i32_1 = arith.constant 0 : i32
    return %c0_i32, %c0_i32_0 : i32, i32
  }
  func.func @transform_13(%arg0: i32) -> (i32, i32) {
    %c0_i32 = arith.constant 0 : i32
    %c0_i32_0 = arith.constant 0 : i32
    %c0_i32_1 = arith.constant 0 : i32
    return %c0_i32, %c0_i32_0 : i32, i32
  }
  func.func @transform_14(%arg0: i32) -> (i32, i32) {
    %c0_i32 = arith.constant 0 : i32
    %c0_i32_0 = arith.constant 0 : i32
    %c0_i32_1 = arith.constant 0 : i32
    return %c0_i32, %c0_i32_0 : i32, i32
  }
  func.func @transform_15(%arg0: i32) -> (i32, i32) {
    %c0_i32 = arith.constant 0 : i32
    %c0_i32_0 = arith.constant 0 : i32
    %c0_i32_1 = arith.constant 0 : i32
    return %c0_i32, %c0_i32_0 : i32, i32
  }
  func.func @transform_16(%arg0: i32) -> (i32, i32) {
    %c0_i32 = arith.constant 0 : i32
    %c0_i32_0 = arith.constant 0 : i32
    %c0_i32_1 = arith.constant 0 : i32
    return %c0_i32, %c0_i32_0 : i32, i32
  }
  func.func @transform_17(%arg0: i32) -> (i32, i32) {
    %c0_i32 = arith.constant 0 : i32
    %c0_i32_0 = arith.constant 0 : i32
    %c0_i32_1 = arith.constant 0 : i32
    return %c0_i32, %c0_i32_0 : i32, i32
  }
  func.func @transform_18(%arg0: i32) -> (i32, i32) {
    %c0_i32 = arith.constant 0 : i32
    %c0_i32_0 = arith.constant 0 : i32
    %c0_i32_1 = arith.constant 0 : i32
    return %c0_i32, %c0_i32_0 : i32, i32
  }
  func.func @transform_19(%arg0: i32) -> (i32, i32) {
    %c0_i32 = arith.constant 0 : i32
    %c0_i32_0 = arith.constant 0 : i32
    %c0_i32_1 = arith.constant 0 : i32
    return %c0_i32, %c0_i32_0 : i32, i32
  }
  func.func @transform_20(%arg0: i32) -> (i32, i32) {
    %c0_i32 = arith.constant 0 : i32
    %c0_i32_0 = arith.constant 0 : i32
    %c0_i32_1 = arith.constant 0 : i32
    return %c0_i32, %c0_i32_0 : i32, i32
  }
  func.func @transform_21(%arg0: i32) -> (i32, i32) {
    %c0_i32 = arith.constant 0 : i32
    %c0_i32_0 = arith.constant 0 : i32
    %c0_i32_1 = arith.constant 0 : i32
    return %c0_i32, %c0_i32_0 : i32, i32
  }
  func.func @transform_22(%arg0: i32) -> (i32, i32, i32) {
    %c0_i32 = arith.constant 0 : i32
    %c0_i32_0 = arith.constant 0 : i32
    %c0_i32_1 = arith.constant 0 : i32
    %c0_i32_2 = arith.constant 0 : i32
    return %c0_i32, %c0_i32_0, %c0_i32_1 : i32, i32, i32
  }
  func.func @transform_23(%arg0: i32) -> (i32, i32, i32) {
    %c0_i32 = arith.constant 0 : i32
    %c0_i32_0 = arith.constant 0 : i32
    %c0_i32_1 = arith.constant 0 : i32
    %c0_i32_2 = arith.constant 0 : i32
    return %c0_i32, %c0_i32_0, %c0_i32_1 : i32, i32, i32
  }
  func.func @transform_24(%arg0: i32) -> (i32, i32, i32, i32) {
    %c0_i32 = arith.constant 0 : i32
    %c0_i32_0 = arith.constant 0 : i32
    %c0_i32_1 = arith.constant 0 : i32
    %c0_i32_2 = arith.constant 0 : i32
    %c0_i32_3 = arith.constant 0 : i32
    return %c0_i32, %c0_i32_0, %c0_i32_1, %c0_i32_2 : i32, i32, i32, i32
  }
  func.func @transform_25(%arg0: i32) -> (i32, i32, i32) {
    %c0_i32 = arith.constant 0 : i32
    %c0_i32_0 = arith.constant 0 : i32
    %c0_i32_1 = arith.constant 0 : i32
    %c0_i32_2 = arith.constant 0 : i32
    return %c0_i32, %c0_i32_0, %c0_i32_1 : i32, i32, i32
  }
}

</mosaic_0001>

<bundles_post_ra>
// kernel: rwkv_block_forward.1
= control target key start
LH: loop header
LB: loop body
LE: loop exit
PB: predicated region body
PF: predicated region fallthrough
CT: control target
= control target key end

     0   :  { %s4750_s0 = inlined_call_operand.vmem [shape: f32[2,8,32], index: 0, kind: input, shape index: {}]   ;;  %s4751_s1 = inlined_call_operand.hbm [shape: f32[2,1,32], index: 1, kind: input, shape index: {}, may-alias: {1,23}]   ;;  %s4752_s2 = inlined_call_operand.hbm [shape: f32[2,2,16,16], index: 2, kind: input, shape index: {}, may-alias: {2,24}]   ;;  %s4753_s3 = inlined_call_operand.hbm [shape: f32[2,1,32], index: 3, kind: input, shape index: {}, may-alias: {3,25}]   ;;  %s4754_s4 = inlined_call_operand.vmem [shape: f32[2,16,16], index: 4, kind: input, shape index: {}]   ;;  %s4755_s5 = inlined_call_operand.vmem [shape: f32[2,8,8], index: 5, kind: input, shape index: {}]   ;;  %s4756_s6 = inlined_call_operand.vmem [shape: f32[4,32], index: 6, kind: input, shape index: {}]   ;;  %s4757_s7 = inlined_call_operand.vmem [shape: f32[4,32], index: 7, kind: input, shape index: {}]   ;;  %s4758_s8 = inlined_call_operand.vmem [shape: f32[6,32], index: 8, kind: input, shape index: {}]   ;;  %s4759_s9 = inlined_call_operand.vmem [shape: f32[1,128], index: 9, kind: input, shape index: {}]   ;;  %s4760_s10 = inlined_call_operand.vmem [shape: bf16[32,160], index: 10, kind: input, shape index: {}]   ;;  %s4761_s11 = inlined_call_operand.vmem [shape: bf16[160,160], index: 11, kind: input, shape index: {}]   ;;  %s4762_s12 = inlined_call_operand.vmem [shape: f32[1,32], index: 12, kind: input, shape index: {}]   ;;  %s4763_s13 = inlined_call_operand.vmem [shape: bf16[32,64], index: 13, kind: input, shape index: {}]   ;;  %s4764_s14 = inlined_call_operand.vmem [shape: bf16[64,32], index: 14, kind: input, shape index: {}]   ;;  %s4765_s15 = inlined_call_operand.vmem [shape: f32[1,32], index: 15, kind: input, shape index: {}]   ;;  %s4766_s16 = inlined_call_operand.vmem [shape: bf16[128,128], index: 16, kind: input, shape index: {}]   ;;  %s4767_s17 = inlined_call_operand.vmem [shape: bf16[32,32], index: 17, kind: input, shape index: {}]   ;;  %s4768_s18 = inlined_call_operand.vmem [shape: f32[2,32], index: 18, kind: input, shape index: {}]   ;;  %s4769_s19 = inlined_call_operand.vmem [shape: bf16[32,128], index: 19, kind: input, shape index: {}]   ;;  %s4770_s20 = inlined_call_operand.vmem [shape: bf16[128,32], index: 20, kind: input, shape index: {}]   ;;  %s4771_s21 = inlined_call_operand.vmem [shape: bf16[32,32], index: 21, kind: input, shape index: {}]   ;;  %s4772_s22 = inlined_call_operand.hbm [shape: f32[2,8,32], index: 22, kind: output, shape index: {0}]   ;;  %s4773_s23 = inlined_call_operand.hbm [shape: f32[2,1,32], index: 23, kind: output, shape index: {1}, may-alias: {1,23}]   ;;  %s4774_s24 = inlined_call_operand.hbm [shape: f32[2,2,16,16], index: 24, kind: output, shape index: {2}, may-alias: {2,24}]   ;;  %s4775_s25 = inlined_call_operand.hbm [shape: f32[2,1,32], index: 25, kind: output, shape index: {3}, may-alias: {3,25}]  }
   0x1   :  { %4790 = sst [smem:[#allocation19_spill]] %s4750_s0 }
   0x2   :  { %4791 = sst [smem:[#allocation20_spill]] %s4751_s1 }
   0x3   :  { %4792 = sst [smem:[#allocation21_spill]] %s4752_s2 }
   0x4   :  { %4793 = sst [smem:[#allocation22_spill]] %s4753_s3 }
   0x5   :  { %4794 = sst [smem:[#allocation23_spill]] %s4754_s4 }
   0x6   :  { %4795 = sst [smem:[#allocation24_spill]] %s4755_s5 }
   0x7   :  { %4796 = sst [smem:[#allocation25_spill]] %s4756_s6 }
   0x8   :  { %4797 = sst [smem:[#allocation26_spill]] %s4757_s7 }
   0x9   :  { %4798 = sst [smem:[#allocation27_spill]] %s4758_s8 }
   0xa   :  { %4799 = sst [smem:[#allocation28_spill]] %s4759_s9 }
   0xb   :  { %31 = vsyncpa [#allocation3], 0 }
   0xc   :  { %32 = vsyncpa [#allocation6], 0 }
   0xd   :  { %33 = vsyncpa [#allocation4], 0 }
   0xe   :  { %34 = vsyncpa [#allocation10], 0 }
   0xf   :  { %35 = vsyncpa [#allocation13], 0  ;;  %s3904_s29 = smov [#allocation5]  }
  0x10   :  { %s55_s2 = sshll.u32 %s3904_s29, 4  ;;  %s56_s2 = int_to_ptr.vmem [resolvable:$true] %s55_s2 }
  0x11   :  { %s3762_s6 = scalar_lea.vmem %s56_s2, 1024  ;;  %p3767_p1 = scmp.lt.s32.totalorder %s56_s2, %s56_s2 }
  0x12   :  { %p3763_p0 = scmp.ne.s32.totalorder %s56_s2, %s3762_s6  ;;  %p3768_p2 = scmp.lt.s32.totalorder %s3762_s6, %s3762_s6 }
  0x14   :  { %p3769_p3 = por %p3768_p2, %p3767_p1 }
  0x16   :  { %p3770_p4 = pnand %p3769_p3, %p3763_p0 }
  0x18   :  { %3773 = shalt.err (!%p3770_p4)
}
  0x19   :  { %s4782_s30 = smov 128   ;;  %s4784_s7 = smov 8  }
  0x1a   :  { %s4800_s1 = sld [smem:[#allocation21_spill]]  ;;  %s3907_s8 = smov [#allocation2]  }
  0x1b   :  { %s43_s27 = sshll.u32 %s3907_s8, 4  ;;  %s44_s27 = int_to_ptr.vmem [resolvable:$true] %s43_s27 }
  0x1c   :  { %s3782_s4 = scalar_lea.vmem %s44_s27, 32  ;;  %p3787_p6 = scmp.lt.s32.totalorder %s44_s27, %s44_s27 }
  0x1d   :  { %p3783_p5 = scmp.ne.s32.totalorder %s44_s27, %s3782_s4  ;;  %p3788_p7 = scmp.lt.s32.totalorder %s3782_s4, %s3782_s4 }
  0x1f   :  { %p3789_p8 = por %p3788_p7, %p3787_p6 }
  0x20   :  { %61 = dma.hbm_to_vmem [thread:$0]  %s4800_s1, 1024, %s56_s2, [#allocation6], %s4782_s30, %s4782_s30, %s4784_s7  }
  0x21   :  { %p3790_p9 = pnand %p3789_p8, %p3783_p5 }
  0x23   :  { %3793 = shalt.err (!%p3790_p9)
}
  0x24   :  { %s4788_s28 = smov 16   ;;  %s4786_s9 = smov 1  }
  0x25   :  { %s4801_s29 = sld [smem:[#allocation20_spill]]  ;;  %s3910_s2 = smov [#allocation7]  }
  0x26   :  { %s67_s6 = sshll.u32 %s3910_s2, 4  ;;  %s68_s6 = int_to_ptr.vmem [resolvable:$true] %s67_s6 }
  0x27   :  { %s3802_s3 = scalar_lea.vmem %s68_s6, 32  ;;  %p3807_p11 = scmp.lt.s32.totalorder %s68_s6, %s68_s6 }
  0x28   :  { %p3803_p10 = scmp.ne.s32.totalorder %s68_s6, %s3802_s3  ;;  %p3808_p12 = scmp.lt.s32.totalorder %s3802_s3, %s3802_s3 }
  0x2a   :  { %p3809_p13 = por %p3808_p12, %p3807_p11 }
  0x2b   :  { %49 = dma.hbm_to_vmem [thread:$0]  %s4801_s29, 32, %s44_s27, [#allocation3], %s4788_s28, %s4788_s28, %s4786_s9  }
  0x2c   :  { %p3810_p0 = pnand %p3809_p13, %p3803_p10 }
  0x2e   :  { %3813 = shalt.err (!%p3810_p0)
}
  0x2f   :  { %s4802_s8 = sld [smem:[#allocation22_spill]] }
  0x35   :  { %73 = dma.hbm_to_vmem [thread:$0]  %s4802_s8, 32, %s68_s6, [#allocation6], %s4788_s28, %s4788_s28, %s4786_s9  }
  0x36   :  { %3894 = dma.done.wait [#allocation3], 32  }
  0x37   :  { %3895 = vsyncadd [#allocation3], 4294967264 }
  0x38   :  { %3896 = dma.done.wait [#allocation6], 1056  }
  0x39   :  { %3897 = vsyncadd [#allocation6], 4294966240  ;;  %vm125_vm0 = vcmask 261120   ;;  %s4803_s5 = sld [smem:[#allocation19_spill]]  ;;  %v3622_v42 = vld [vmem:[%s4760_s10 + $0x14] ss:$8 sps:$4 sm:$0xff]  }
  0x3a   :  { %s4804_s3 = sld [smem:[#allocation25_spill]]  ;;  %v3624_v43 = vld [vmem:[%s4760_s10 + $0x10] ss:$8 sps:$4 sm:$0xff]   ;;  %268 = vmatprep.subr.bf16.mxu1 %v3622_v42  ;;  %v3625_v44 = vld [vmem:[%s4760_s10 + $0x4] ss:$8 sps:$4 sm:$0xff]   ;;  %v3911_v46 = vmov 0  }
  0x3b   :  { %s4805_s8 = sld [smem:[#allocation26_spill]]  ;;  %269 = vmatpush1.bf16.msra.mxu1 %v3624_v43  ;;  %v3627_v45 = vld [vmem:[%s4760_s10] ss:$8 sps:$4 sm:$0xff]   ;;  %288 = vmatprep.mubr.bf16.mxu1 %v3911_v46  ;;  %vm3147_vm1 = vcmask 261127   ;;  %vm209_vm2 = vcmask 1040384   ;;  %s3913_s0 = smov 64  }
  0x3c   :  { %270 = vmatprep.subr.bf16.mxu1 %v3625_v44  ;;  %v205_v61 = vld [vmem:[#allocation2] sm:$0x1]  ;;  %s4806_s6 = sld [smem:[#allocation27_spill]]  ;;  %s3914_s2 = smov 96   ;;  %vm3916_vm3 = vmmov 0   ;;  %vm494_vm4 = vcmask 785408  }
  0x3d   :  { %s4807_s27 = sld [smem:[#allocation28_spill]]  ;;  %vm491_vm5 = vcmask 523264   ;;  %vm840_vm6 = vcmask 130048   ;;  %s3917_s29 = smov 80   ;;  %vm1233_vm7 = vcmask 64512  }
  0x3e   :  { %s3918_s1 = smov 112  }
  0x3f   :  { %v120_v0 = vld [vmem:[%s4803_s5] sm:$0xff]  ;;  %v3221_v1 = vld [vmem:[%s4803_s5 + $0x8] sm:$0xff]  ;;  %271 = vmatpush1.bf16.msra.mxu1 %v3627_v45  ;;  %s3912_s5 = smov 32   ;;  %v3658_v45 = vld [vmem:[%s4766_s16 + $0x38] sm:$0xff]  }
  0x40   :  { %v126_v2 = vsel %vm125_vm0, %v120_v0, 0.0  ;;  %v129_v3 = vsel %vm125_vm0, %v3221_v1, 0.0  ;;  %v3222_v21 = vld [vmem:[%s4804_s3] ss:$0 sm:$0xff]  ;;  %v3224_v54 = vld [vmem:[%s4804_s3 + $0x1] ss:$0 sm:$0xff] }
  0x41   :  { %127 = vadd.xlane.f32.xlu0 %v126_v2  ;;  %v3223_v23 = vld [vmem:[%s4805_s8] ss:$0 sm:$0xff]  ;;  %v3225_v56 = vld [vmem:[%s4805_s8 + $0x1] ss:$0 sm:$0xff] }
  0x45   :  { %130 = vadd.xlane.f32.xlu0 %v129_v3  ;;  %v212_v3 = vld [vmem:[#allocation2 + $0x1] sm:$0x1] }
  0xca   :  { %v128_v4 = vpop.xlane.xlu0 %127 }
  0xcb   :  { %v133_v5 = vmul.f32 0.03125, %v128_v4 }
  0xcd   :  { %v135_v6 = vsub.f32 %v120_v0, %v133_v5  ;;  %v3226_v5 = vld [vmem:[%s4806_s6] ss:$0 sm:$0xff] }
  0xce   :  { %v131_v7 = vpop.xlane.xlu0 %130 }
  0xcf   :  { %v134_v8 = vmul.f32 0.03125, %v131_v7  ;;  %v137_v9 = vmul.f32 %v135_v6, %v135_v6 }
  0xd1   :  { %v136_v10 = vsub.f32 %v3221_v1, %v134_v8  ;;  %v139_v11 = vsel %vm125_vm0, %v137_v9, 0.0  ;;  %v3630_v9 = vld [vmem:[%s4761_s11 + $0x74] ss:$8 sps:$4 sm:$0xff]  }
  0xd2   :  { %140 = vadd.xlane.f32.xlu1 %v139_v11  ;;  %428 = vmatprep.subr.bf16.mxu1 %v3630_v9 }
  0xd3   :  { %v138_v12 = vmul.f32 %v136_v10, %v136_v10 }
  0xd5   :  { %v142_v13 = vsel %vm125_vm0, %v138_v12, 0.0 }
  0xd6   :  { %143 = vadd.xlane.f32.xlu1 %v142_v13 }
 0x15b   :  { %v141_v14 = vpop.xlane.xlu1 %140 }
 0x15c   :  { %v145_v15 = vmul.f32 0.03125, %v141_v14  ;;  %v3628_v14 = vld [vmem:[%s4761_s11 + $0x70] ss:$8 sps:$4 sm:$0xff]  }
 0x15e   :  { %v147_v16 = vadd.f32 1e-05, %v145_v15  ;;  %v3633_v15 = vld [vmem:[%s4761_s11 + $0x64] ss:$8 sps:$4 sm:$0xff]  }
 0x15f   :  { %v144_v17 = vpop.xlane.xlu1 %143 }
 0x160   :  { %3686 = vrsqrt.f32 %v147_v16  ;;  %v146_v18 = vmul.f32 0.03125, %v144_v17  ;;  %v3631_v16 = vld [vmem:[%s4761_s11 + $0x60] ss:$8 sps:$4 sm:$0xff]   ;;  %v3636_v17 = vld [vmem:[%s4761_s11 + $0x54] ss:$8 sps:$4 sm:$0xff]  }
 0x162   :  { %v148_v19 = vadd.f32 1e-05, %v146_v18  ;;  %v3634_v18 = vld [vmem:[%s4761_s11 + $0x50] ss:$8 sps:$4 sm:$0xff]  }
 0x164   :  { %3688 = vrsqrt.f32 %v148_v19  ;;  %v3639_v19 = vld [vmem:[%s4761_s11 + $0x44] ss:$8 sps:$4 sm:$0xff]  }
 0x16d   :  { %v3687_v20 = vpop.eup %3686 }
 0x16e   :  { %v151_v22 = vmul.f32 %v3687_v20, %v135_v6  ;;  %v3637_v20 = vld [vmem:[%s4761_s11 + $0x40] ss:$8 sps:$4 sm:$0xff]  }
 0x170   :  { %v157_v24 = vmul.f32 %v3222_v21, %v151_v22  ;;  %v3640_v22 = vld [vmem:[%s4761_s11 + $0x30] ss:$8 sps:$4 sm:$0xff]  }
 0x171   :  { %v3689_v25 = vpop.eup %3688 }
 0x172   :  { %v4088_v26 = vadd.f32 %v3223_v23, %v157_v24  ;;  %v152_v27 = vmul.f32 %v3689_v25, %v136_v10  ;;  %v3643_v24 = vld [vmem:[%s4761_s11 + $0x20] ss:$8 sps:$4 sm:$0xff]   ;;  %v3648_v25 = vld [vmem:[%s4761_s11 + $0x14] ss:$8 sps:$4 sm:$0xff]  }
 0x174   :  { %v167_v28 = vsel %vm125_vm0, %v4088_v26, 0.0  ;;  %v158_v29 = vmul.f32 %v3222_v21, %v152_v27  ;;  %v3642_v21 = vld [vmem:[%s4761_s11 + $0x34] ss:$8 sps:$4 sm:$0xff]   ;;  %v3646_v27 = vld [vmem:[%s4761_s11 + $0x10] ss:$8 sps:$4 sm:$0xff]  }
 0x175   :  { %168 = vadd.xlane.f32.xlu0 %v167_v28  ;;  %v3651_v28 = vld [vmem:[%s4761_s11 + $0x4] ss:$8 sps:$4 sm:$0xff]  }
 0x176   :  { %v4092_v30 = vadd.f32 %v3223_v23, %v158_v29  ;;  %v3645_v23 = vld [vmem:[%s4761_s11 + $0x24] ss:$8 sps:$4 sm:$0xff]   ;;  %v3649_v29 = vld [vmem:[%s4761_s11] ss:$8 sps:$4 sm:$0xff]  }
 0x178   :  { %v170_v31 = vsel %vm125_vm0, %v4092_v30, 0.0 }
 0x179   :  { %171 = vadd.xlane.f32.xlu1 %v170_v31  ;;  %v3654_v31 = vld [vmem:[%s4761_s11 + $0x94] ss:$8 sps:$4 sm:$0xff]  }
 0x1fe   :  { %v169_v32 = vpop.xlane.xlu0 %168 }
 0x1ff   :  { %v173_v33 = vmul.f32 0.03125, %v169_v32  ;;  %v3652_v32 = vld [vmem:[%s4761_s11 + $0x90] ss:$8 sps:$4 sm:$0xff]  }
 0x201   :  { %v175_v34 = vsub.f32 %v4088_v26, %v173_v33  ;;  %v3657_v33 = vld [vmem:[%s4761_s11 + $0x84] ss:$8 sps:$4 sm:$0xff]  }
 0x202   :  { %v172_v35 = vpop.xlane.xlu1 %171 }
 0x203   :  { %v174_v36 = vmul.f32 0.03125, %v172_v35  ;;  %v177_v37 = vmul.f32 %v175_v34, %v175_v34 }
 0x205   :  { %v176_v38 = vsub.f32 %v4092_v30, %v174_v36  ;;  %v179_v39 = vsel %vm125_vm0, %v177_v37, 0.0 }
 0x206   :  { %180 = vadd.xlane.f32.xlu0 %v179_v39 }
 0x207   :  { %v178_v40 = vmul.f32 %v176_v38, %v176_v38 }
 0x209   :  { %v182_v41 = vsel %vm125_vm0, %v178_v40, 0.0 }
 0x20a   :  { %183 = vadd.xlane.f32.xlu1 %v182_v41 }
 0x28f   :  { %v181_v47 = vpop.xlane.xlu0 %180 }
 0x290   :  { %v185_v48 = vmul.f32 0.03125, %v181_v47  ;;  %v3915_v47 = vmov 0.0  }
 0x291   :  { %3414 = vmatprep.subr.bf16.mxu0 %v3915_v47  ;;  %3430 = vmatprep.mubr.msk.bf16.mxu0 %vm3916_vm3, %v3915_v47 }
 0x292   :  { %v187_v49 = vadd.f32 1e-05, %v185_v48  ;;  %3415 = vmatpush3.bf16.msra.mxu0 %v3658_v45  ;;  %v3659_v48 = vld [vmem:[%s4766_s16 + $0x30] sm:$0xff]   ;;  %v3668_v45 = vld [vmem:[%s4764_s14 + $0x18] sm:$0xff]  }
 0x293   :  { %v184_v50 = vpop.xlane.xlu1 %183  ;;  %3416 = vmatprep.subr.bf16.mxu0 %v3915_v47 }
 0x294   :  { %3690 = vrsqrt.f32 %v187_v49  ;;  %v186_v51 = vmul.f32 0.03125, %v184_v50  ;;  %v3660_v49 = vld [vmem:[%s4766_s16 + $0x28] sm:$0xff]   ;;  %v3661_v50 = vld [vmem:[%s4766_s16 + $0x20] sm:$0xff]  }
 0x296   :  { %v188_v52 = vadd.f32 1e-05, %v186_v51  ;;  %3417 = vmatpush3.bf16.msra.mxu0 %v3659_v48  ;;  %v3662_v51 = vld [vmem:[%s4766_s16 + $0x18] sm:$0xff]   ;;  %v3669_v48 = vld [vmem:[%s4764_s14 + $0x10] sm:$0xff]  }
 0x297   :  { %3418 = vmatprep.subr.bf16.mxu0 %v3915_v47 }
 0x298   :  { %3692 = vrsqrt.f32 %v188_v52  ;;  %v3663_v52 = vld [vmem:[%s4766_s16 + $0x10] sm:$0xff]  }
 0x29a   :  { %3419 = vmatpush3.bf16.msra.mxu0 %v3660_v49  ;;  %v3670_v49 = vld [vmem:[%s4764_s14 + $0x8] sm:$0xff]  }
 0x29b   :  { %3420 = vmatprep.subr.bf16.mxu0 %v3915_v47 }
 0x29e   :  { %3421 = vmatpush3.bf16.msra.mxu0 %v3661_v50  ;;  %v3671_v50 = vld [vmem:[%s4764_s14] sm:$0xff]   ;;  %s4809_s14 = sld [smem:[#allocation24_spill]] }
 0x29f   :  { %3422 = vmatprep.subr.bf16.mxu0 %v3915_v47 }
 0x2a1   :  { %v3691_v53 = vpop.eup %3690 }
 0x2a2   :  { %v191_v55 = vmul.f32 %v3691_v53, %v175_v34  ;;  %v3655_v34 = vld [vmem:[%s4761_s11 + $0x80] ss:$8 sps:$4 sm:$0xff]   ;;  %3423 = vmatpush3.bf16.msra.mxu0 %v3662_v51 }
 0x2a3   :  { %3424 = vmatprep.subr.bf16.mxu0 %v3915_v47  ;;  %v3664_v53 = vld [vmem:[%s4766_s16 + $0x8] sm:$0xff]  }
 0x2a4   :  { %v197_v57 = vmul.f32 %v3224_v54, %v191_v55 }
 0x2a5   :  { %v3693_v58 = vpop.eup %3692 }
 0x2a6   :  { %v4119_v59 = vadd.f32 %v3225_v56, %v197_v57  ;;  %v192_v60 = vmul.f32 %v3693_v58, %v176_v38  ;;  %3425 = vmatpush3.bf16.msra.mxu0 %v3663_v52 }
 0x2a7   :  { %3426 = vmatprep.subr.bf16.mxu0 %v3915_v47 }
 0x2a8   :  { %v198_v62 = vmul.f32 %v3224_v54, %v192_v60  ;;  %471 = vrot.lane.b32.xlu0 %v4119_v59, %s3912_s5  ;;  %v207_v63 = vrot.slane %v4119_v59, 7  ;;  %3148 = vst.msk [vmem:[#allocation9 - $0x7] sm:$0x80] %vm3147_vm1, %v4119_v59  ;;  %v3264_v54 = vld [vmem:[%s4806_s6 + $0x1] ss:$0 sm:$0xff] }
 0x2aa   :  { %v4126_v0 = vadd.f32 %v3225_v56, %v198_v62  ;;  %v210_v1 = vsel %vm209_vm2, %v205_v61, %v207_v63  ;;  %3427 = vmatpush3.bf16.msra.mxu0 %v3664_v53  ;;  %v3665_v56 = vld [vmem:[%s4766_s16] sm:$0xff]   ;;  %s3919_s16 = smov 48  }
 0x2ab   :  { %v4130_v2 = vsub.f32 %v210_v1, %v4119_v59  ;;  %3428 = vmatprep.subr.bf16.mxu0 %v3915_v47 }
 0x2ac   :  { %473 = vrot.lane.b32.xlu1 %v4126_v0, %s3912_s5  ;;  %477 = vrot.lane.b32.xlu0 %v4119_v59, %s3913_s0  ;;  %v214_v4 = vrot.slane %v4126_v0, 7  ;;  %3153 = vst.msk [vmem:[#allocation9 - $0x6] sm:$0x80] %vm3147_vm1, %v4126_v0 }
 0x2ad   :  { %v224_v8 = vmul.f32 %v3226_v5, %v4130_v2 }
 0x2ae   :  { %v216_v6 = vsel %vm209_vm2, %v212_v3, %v214_v4  ;;  %3429 = vmatpush3.bf16.msra.mxu0 %v3665_v56 }
 0x2af   :  { %v4144_v7 = vsub.f32 %v216_v6, %v4126_v0  ;;  %v226_v11 = vadd.f32 %v224_v8, %v4119_v59  ;;  %3434 = vmatprep.subr.bf16.mxu0 %v3915_v47 }
 0x2b0   :  { %479 = vrot.lane.b32.xlu1 %v4126_v0, %s3913_s0  ;;  %499 = vrot.lane.b32.xlu0 %v4130_v2, %s3912_s5 }
 0x2b1   :  { %v225_v10 = vmul.f32 %v3226_v5, %v4144_v7 }
 0x2b3   :  { %v227_v12 = vadd.f32 %v225_v10, %v4126_v0 }
 0x2b4   :  { %501 = vrot.lane.b32.xlu1 %v4144_v7, %s3912_s5  ;;  %505 = vrot.lane.b32.xlu0 %v4130_v2, %s3913_s0 }
 0x2b5   :  { %v228_v13 = vpack.c.bf16 %v227_v12, %v226_v11 }
 0x2b7   :  { %3231 = vmatmul.mubr.msk.bf16.vlgmr.msra.gmra.mxu1 %vm125_vm0, %v228_v13 }
 0x2b8   :  { %507 = vrot.lane.b32.xlu1 %v4144_v7, %s3913_s0  ;;  %511 = vrot.lane.b32.xlu0 %v4130_v2, %s3914_s2 }
 0x2b9   :  { %429 = vmatpush1.bf16.msra.mxu1 %v3628_v14 }
 0x2ba   :  { %430 = vmatprep.subr.bf16.mxu1 %v3633_v15 }
 0x2bc   :  { %513 = vrot.lane.b32.xlu1 %v4144_v7, %s3914_s2 }
 0x2bd   :  { %431 = vmatpush1.bf16.msra.mxu1 %v3631_v16 }
 0x2be   :  { %432 = vmatprep.subr.bf16.mxu1 %v3636_v17 }
 0x2c1   :  { %433 = vmatpush1.bf16.msra.mxu1 %v3634_v18  ;;  %v3253_v18 = vld [vmem:[%s4807_s27] ss:$0 sm:$0xff]  ;;  %s4808_s27 = sld [smem:[#allocation23_spill]] }
 0x2c2   :  { %434 = vmatprep.subr.bf16.mxu1 %v3639_v19 }
 0x2c5   :  { %435 = vmatpush1.bf16.msra.mxu1 %v3637_v20 }
 0x2c6   :  { %436 = vmatprep.subr.bf16.mxu1 %v3642_v21 }
 0x2c9   :  { %437 = vmatpush1.bf16.msra.mxu1 %v3640_v22 }
 0x2ca   :  { %438 = vmatprep.subr.bf16.mxu1 %v3645_v23 }
 0x2cd   :  { %439 = vmatpush1.bf16.msra.mxu1 %v3643_v24 }
 0x2ce   :  { %440 = vmatprep.subr.bf16.mxu1 %v3648_v25 }
 0x2d1   :  { %441 = vmatpush1.bf16.msra.mxu1 %v3646_v27 }
 0x2d2   :  { %442 = vmatprep.subr.bf16.mxu1 %v3651_v28 }
 0x2d5   :  { %443 = vmatpush1.bf16.msra.mxu1 %v3649_v29 }
 0x2d6   :  { %456 = vmatprep.subr.bf16.mxu1 %v3654_v31 }
 0x2d9   :  { %457 = vmatpush2.bf16.msra.mxu1 %v3652_v32 }
 0x2da   :  { %458 = vmatprep.subr.bf16.mxu1 %v3657_v33 }
 0x2dd   :  { %459 = vmatpush2.bf16.msra.mxu1 %v3655_v34 }
 0x2de   :  { %3442 = vmatprep.subr.bf16.mxu1 %v3915_v47 }
 0x31a   :  { %v472_v8 = vpop.permute.xlu0 %471 }
 0x31b   :  { %v489_v28 = vsel %vm125_vm0, %v4119_v59, %v472_v8 }
 0x31e   :  { %v474_v6 = vpop.permute.xlu1 %473  ;;  %v478_v10 = vpop.permute.xlu0 %477 }
 0x31f   :  { %v492_v33 = vsel %vm491_vm5, %v489_v28, %v478_v10 }
 0x322   :  { %v480_v9 = vpop.permute.xlu1 %479  ;;  %v500_v12 = vpop.permute.xlu0 %499 }
 0x323   :  { %v517_v23 = vsel %vm125_vm0, %v4130_v2, %v500_v12 }
 0x326   :  { %v502_v11 = vpop.permute.xlu1 %501  ;;  %v506_v14 = vpop.permute.xlu0 %505 }
 0x327   :  { %v519_v24 = vsel %vm491_vm5, %v517_v23, %v506_v14  ;;  %v518_v29 = vsel %vm125_vm0, %v4144_v7, %v502_v11 }
 0x32a   :  { %v508_v13 = vpop.permute.xlu1 %507  ;;  %v512_v16 = vpop.permute.xlu0 %511 }
 0x32b   :  { %v521_v31 = vsel %vm494_vm4, %v519_v24, %v512_v16  ;;  %v520_v34 = vsel %vm491_vm5, %v518_v29, %v508_v13 }
 0x32e   :  { %v514_v15 = vpop.permute.xlu1 %513 }
 0x377   :  { %v290_v35 = vpop.f32.mrf.mxu1 }
 0x379   :  { %v292_v36 = vpop.f32.mrf.mxu1 }
 0x37a   :  { %3694 = vtanh.f32 %v292_v36  ;;  %v490_v36 = vsel %vm125_vm0, %v4126_v0, %v474_v6 }
 0x37b   :  { %v294_v37 = vpop.f32.mrf.mxu1 }
 0x37c   :  { %3696 = vtanh.f32 %v294_v37  ;;  %v522_v37 = vsel %vm494_vm4, %v520_v34, %v514_v15 }
 0x37d   :  { %v296_v38 = vpop.f32.mrf.mxu1 }
 0x37e   :  { %3698 = vtanh.f32 %v296_v38  ;;  %v493_v38 = vsel %vm491_vm5, %v490_v36, %v480_v9 }
 0x37f   :  { %3700 = vtanh.f32 %v290_v35 }
 0x387   :  { %v3695_v39 = vpop.eup %3694 }
 0x389   :  { %v3697_v40 = vpop.eup %3696 }
 0x38b   :  { %v3699_v41 = vpop.eup %3698 }
 0x38c   :  { %v3701_v42 = vpop.eup %3700  ;;  %v304_v43 = vpack.c.bf16 %v3699_v41, %v3695_v39 }
 0x38d   :  { %v303_v44 = vpack.c.bf16 %v3697_v40, %v3701_v42 }
 0x38e   :  { %3252 = vmatprep.mubr.msk.bf16.mxu1 %vm125_vm0, %v304_v43  ;;  %v3666_v43 = vld [vmem:[%s4763_s13 + $0x8] sm:$0xff]  }
 0x38f   :  { %461 = vmatmul.mubr.bf16.vlgmr.msra.gmra.mxu1 %v303_v44 }
 0x390   :  { %3450 = vmatprep.mubr.msk.bf16.mxu1 %vm3916_vm3, %v3915_v47  ;;  %3443 = vmatpush3.bf16.msra.mxu1 %v3668_v45 }
 0x391   :  { %3444 = vmatprep.subr.bf16.mxu1 %v3915_v47 }
 0x394   :  { %3445 = vmatpush3.bf16.msra.mxu1 %v3669_v48 }
 0x395   :  { %3446 = vmatprep.subr.bf16.mxu1 %v3915_v47 }
 0x398   :  { %3447 = vmatpush3.bf16.msra.mxu1 %v3670_v49 }
 0x399   :  { %3448 = vmatprep.subr.bf16.mxu1 %v3915_v47 }
 0x39c   :  { %3449 = vmatpush3.bf16.msra.mxu1 %v3671_v50 }
 0x44f   :  { %v462_v55 = vpop.f32.mrf.mxu1 }
 0x450   :  { %v677_v57 = vadd.f32 %v3264_v54, %v462_v55  ;;  %534 = vrot.lane.b32.xlu1 %v462_v55, %s3914_s2 }
 0x451   :  { %v464_v58 = vpop.f32.mrf.mxu1 }
 0x452   :  { %v679_v61 = vmul.f32 %v677_v57, %v4130_v2 }
 0x453   :  { %v466_v60 = vpop.f32.mrf.mxu1 }
 0x454   :  { %v678_v62 = vadd.f32 %v3264_v54, %v466_v60  ;;  %536 = vrot.lane.b32.xlu1 %v464_v58, %s3914_s2  ;;  %538 = vrot.lane.b32.xlu0 %v466_v60, %s3914_s2  ;;  %v681_v3 = vadd.f32 %v679_v61, %v4119_v59 }
 0x455   :  { %v468_v1 = vpop.f32.mrf.mxu1 }
 0x456   :  { %v680_v63 = vmul.f32 %v678_v62, %v4144_v7 }
 0x458   :  { %v682_v4 = vadd.f32 %v680_v63, %v4126_v0  ;;  %483 = vrot.lane.b32.xlu0 %v4119_v59, %s3914_s2  ;;  %540 = vrot.lane.b32.xlu1 %v468_v1, %s3914_s2  ;;  %v838_v63 = vld [vmem:[%s4808_s27] sm:$0xff]  ;;  %v3276_v1 = vld [vmem:[%s4808_s27 + $0x10] sm:$0xff] }
 0x45a   :  { %v683_v5 = vpack.c.bf16 %v682_v4, %v681_v3  ;;  %v3273_v3 = vld [vmem:[%s4762_s12] ss:$0 sm:$0xff] }
 0x45c   :  { %485 = vrot.lane.b32.xlu1 %v4126_v0, %s3914_s2  ;;  %v3667_v0 = vld [vmem:[%s4763_s13] sm:$0xff]  }
 0x4c2   :  { %v535_v17 = vpop.permute.xlu1 %534 }
 0x4c6   :  { %v537_v19 = vpop.permute.xlu1 %536  ;;  %v539_v20 = vpop.permute.xlu0 %538 }
 0x4c7   :  { %v542_v21 = vsel %vm494_vm4, %v535_v17, %v537_v19  ;;  %v839_v17 = vld [vmem:[%s4808_s27 + $0x8] sm:$0xff] }
 0x4c8   :  { %v546_v22 = vadd.f32 %v3253_v18, %v542_v21  ;;  %v4361_v19 = vld [vmem:[#allocation5 + $0x8] sm:$0xff] }
 0x4ca   :  { %v484_v25 = vpop.permute.xlu0 %483  ;;  %v541_v27 = vpop.permute.xlu1 %540  ;;  %v548_v35 = vmul.f32 %v546_v22, %v521_v31 }
 0x4cb   :  { %v543_v32 = vsel %vm494_vm4, %v539_v20, %v541_v27  ;;  %v495_v59 = vsel %vm494_vm4, %v492_v33, %v484_v25  ;;  %v4365_v20 = vld [vmem:[#allocation5] sm:$0xff] }
 0x4cc   :  { %v547_v2 = vadd.f32 %v3253_v18, %v543_v32  ;;  %v550_v41 = vadd.f32 %v548_v35, %v495_v59  ;;  %v3277_v18 = vld [vmem:[%s4808_s27 + $0x18] sm:$0xff] }
 0x4ce   :  { %v549_v7 = vmul.f32 %v547_v2, %v522_v37  ;;  %v486_v39 = vpop.permute.xlu1 %485  ;;  %v3280_v37 = vld [vmem:[%s4765_s15] ss:$0 sm:$0xff] }
 0x4cf   :  { %v496_v40 = vsel %vm494_vm4, %v493_v38, %v486_v39 }
 0x4d0   :  { %v551_v42 = vadd.f32 %v549_v7, %v496_v40 }
 0x4d2   :  { %v552_v44 = vpack.c.bf16 %v551_v42, %v550_v41 }
 0x4d4   :  { %3431 = vmatmul.mubr.bf16.vlgmr.msra.gmra.mxu0 %v552_v44 }
 0x4d5   :  { %3435 = vmatpush3.bf16.msra.mxu0 %v3666_v43  ;;  %3438 = vmatprep.mubr.msk.bf16.mxu0 %vm3916_vm3, %v3915_v47 }
 0x4d6   :  { %3436 = vmatprep.subr.bf16.mxu0 %v3915_v47 }
 0x4d9   :  { %3437 = vmatpush3.bf16.msra.mxu0 %v3667_v0 }
 0x4dc   :  { %3439 = vmatmul.mubr.msk.bf16.vlgmr.msra.gmra.mxu0 %vm125_vm0, %v683_v5 }
 0x4dd   :  { %3465 = vmatprep.mubr.msk.f32.mxu0 %vm840_vm6, %v3276_v1 }
 0x594   :  { %v4325_v51 = vpop.f32.mrf.mxu0 }
 0x596   :  { %v3432_v52 = vpop.f32.mrf.mxu0 }
 0x598   :  { %v4327_v53 = vpop.f32.mrf.mxu0 }
 0x59a   :  { %v3433_v54 = vpop.f32.mrf.mxu0 }
 0x59c   :  { %v737_v55 = vpop.f32.mrf.mxu0 }
 0x59d   :  { %3702 = vtanh.f32 %v737_v55 }
 0x59e   :  { %v3440_v56 = vpop.f32.mrf.mxu0 }
 0x5a0   :  { %v740_v57 = vpop.f32.mrf.mxu0 }
 0x5a1   :  { %3704 = vtanh.f32 %v740_v57 }
 0x5a2   :  { %v3441_v58 = vpop.f32.mrf.mxu0 }
 0x5aa   :  { %v3703_v60 = vpop.eup %3702 }
 0x5ae   :  { %v3705_v61 = vpop.eup %3704 }
 0x5af   :  { %v746_v62 = vpack.c.bf16 %v3705_v61, %v3703_v60 }
 0x5b1   :  { %3451 = vmatmul.mubr.msk.bf16.vlgmr.msra.gmra.mxu1 %vm491_vm5, %v746_v62 }
 0x5b2   :  { %3458 = vmatprep.mubr.msk.f32.mxu1 %vm840_vm6, %v838_v63 }
 0x671   :  { %v816_v4 = vpop.f32.mrf.mxu1 }
 0x672   :  { %v830_v5 = vadd.f32 %v3273_v3, %v816_v4 }
 0x673   :  { %v3452_v6 = vpop.f32.mrf.mxu1 }
 0x674   :  { %v832_v8 = vmul.f32 1.442695, %v830_v5 }
 0x675   :  { %v819_v9 = vpop.f32.mrf.mxu1 }
 0x676   :  { %v831_v10 = vadd.f32 %v3273_v3, %v819_v9  ;;  %3706 = vpow2.f32 %v832_v8 }
 0x677   :  { %v3453_v11 = vpop.f32.mrf.mxu1 }
 0x678   :  { %v834_v12 = vmul.f32 1.442695, %v831_v10 }
 0x67a   :  { %3708 = vpow2.f32 %v834_v12 }
 0x683   :  { %v3707_v13 = vpop.eup %3706 }
 0x684   :  { %v836_v16 = vsub.f32 0.0, %v3707_v13 }
 0x687   :  { %v3709_v14 = vpop.eup %3708 }
 0x688   :  { %v4341_v15 = vsub.f32 0.0, %v3709_v14 }
 0x68a   :  { %3454 = vmatprep.subr.mxu1 %v4341_v15  ;;  %3461 = vmatprep.subr.mxu0 %v4341_v15 }
 0x68b   :  { %3455 = vmatpush3.msra.mxu1 %v4341_v15  ;;  %3462 = vmatpush3.msra.mxu0 %v4341_v15 }
 0x68c   :  { %3456 = vmatprep.subr.mxu1 %v836_v16  ;;  %3463 = vmatprep.subr.mxu0 %v836_v16 }
 0x68d   :  { %3457 = vmatpush3.msra.mxu1 %v836_v16  ;;  %3464 = vmatpush3.msra.mxu0 %v836_v16 }
 0x68e   :  { %3459 = vmatmul.mubr.msk.f32.vlgmr.msra.gmra.mxu1 %vm840_vm6, %v839_v17  ;;  %3466 = vmatmul.mubr.msk.f32.vlgmr.msra.gmra.mxu0 %vm840_vm6, %v3277_v18 }
 0x68f   :  { %3473 = vmatprep.subr.mxu1 %v3915_v47  ;;  %3477 = vmatprep.mubr.msk.f32.mxu1 %vm3916_vm3, %v3915_v47 }
 0x690   :  { %3468 = vmatprep.subr.mxu0 %v3915_v47  ;;  %3470 = vmatprep.mubr.msk.f32.mxu0 %vm3916_vm3, %v3915_v47 }
 0x691   :  { %3474 = vmatpush3.msra.mxu1 %v4361_v19 }
 0x692   :  { %3475 = vmatprep.subr.mxu1 %v3915_v47 }
 0x693   :  { %3476 = vmatpush3.msra.mxu1 %v4365_v20 }
 0x74e   :  { %v4368_v21 = vpop.f32.mrf.mxu1  ;;  %v4409_v49 = vpop.f32.mrf.mxu0 }
 0x74f   :  { %v1015_v32 = vsub.f32 0.0, %v4368_v21  ;;  %v923_v48 = vsub.f32 %v4368_v21, %v4341_v15  ;;  %v1031_v56 = vsub.f32 %v4409_v49, %v4368_v21  ;;  %v4452_v21 = vld [vmem:[%s4809_s14 + $0x8] sm:$0xff] }
 0x750   :  { %v913_v22 = vpop.f32.mrf.mxu1  ;;  %v4411_v52 = vpop.f32.mrf.mxu0 }
 0x751   :  { %v922_v23 = vsub.f32 %v913_v22, %v836_v16  ;;  %v1014_v24 = vsub.f32 0.0, %v913_v22  ;;  %v1018_v33 = vmul.f32 1.442695, %v1015_v32  ;;  %v1010_v50 = vmul.f32 1.442695, %v923_v48 }
 0x752   :  { %v1030_v54 = vsub.f32 %v4411_v52, %v913_v22  ;;  %v1034_v60 = vmul.f32 1.442695, %v1031_v56  ;;  %v4457_v22 = vld [vmem:[%s4809_s14] sm:$0xff] }
 0x753   :  { %v1008_v25 = vmul.f32 1.442695, %v922_v23  ;;  %v1016_v27 = vmul.f32 1.442695, %v1014_v24 }
 0x754   :  { %v1032_v57 = vmul.f32 1.442695, %v1030_v54 }
 0x755   :  { %3710 = vpow2.f32 %v1008_v25 }
 0x756   :  { %3712 = vpow2.f32 %v1016_v27 }
 0x757   :  { %3714 = vpow2.f32 %v1018_v33 }
 0x758   :  { %3716 = vpow2.f32 %v1010_v50  ;;  %v4497_v50 = vld [vmem:[#allocation5 + $0x10] sm:$0xff] }
 0x759   :  { %3718 = vpow2.f32 %v1032_v57  ;;  %v4513_v57 = vld [vmem:[#allocation5 + $0x20] sm:$0xff] }
 0x75a   :  { %3720 = vpow2.f32 %v1034_v60  ;;  %v4529_v60 = vld [vmem:[#allocation5 + $0x30] sm:$0xff] }
 0x762   :  { %v3711_v28 = vpop.eup %3710 }
 0x763   :  { %v3713_v29 = vpop.eup %3712  ;;  %v1012_v31 = vmul.f32 %v3711_v28, %v4325_v51 }
 0x764   :  { %1022 = vrot.lane.b32.xlu0 %v3713_v29, %s3912_s5  ;;  %v3715_v7 = vpop.eup %3714 }
 0x765   :  { %3478 = vmatmul.mubr.msk.f32.vlgmr.msra.gmra.mxu1 %vm840_vm6, %v1012_v31  ;;  %v3717_v61 = vpop.eup %3716 }
 0x766   :  { %v4422_v62 = vmul.f32 %v3717_v61, %v4327_v53  ;;  %v3719_v63 = vpop.eup %3718 }
 0x767   :  { %v3721_v1 = vpop.eup %3720 }
 0x768   :  { %1052 = vrot.lane.b32.xlu0 %v4325_v51, %s3914_s2 }
 0x76c   :  { %1230 = vrot.lane.b32.xlu0 %v4325_v51, %s3913_s0 }
 0x7d6   :  { %v1023_v34 = vpop.permute.xlu0 %1022 }
 0x7d7   :  { %v1028_v35 = vmul.f32 %v1023_v34, %v4325_v51 }
 0x7d9   :  { %1486 = vrot.lane.b32.xlu0 %v1028_v35, %s3917_s29  ;;  %1077 = vrot.lane.b32.xlu1 %v1028_v35, %s3914_s2 }
 0x7da   :  { %v1053_v2 = vpop.permute.xlu0 %1052 }
 0x7db   :  { %v1058_v36 = vmul.f32 %v1053_v2, %v4325_v51 }
 0x7dd   :  { %1484 = vrot.lane.b32.xlu0 %v1012_v31, %s3918_s1  ;;  %v1067_v38 = vmul.f32 %v3280_v37, %v1058_v36 }
 0x7de   :  { %v1231_v59 = vpop.permute.xlu0 %1230 }
 0x7df   :  { %3485 = vmatprep.subr.mxu1 %v1231_v59  ;;  %v1154_v39 = vsel %vm840_vm6, %v1067_v38, 0.0 }
 0x7e0   :  { %3486 = vmatpush3.msra.mxu1 %v1231_v59 }
 0x7e1   :  { %1563 = vrot.lane.b32.xlu0 %v1067_v38, %s3918_s1  ;;  %3495 = vmatprep.subr.mxu1 %v3915_v47 }
 0x7e5   :  { %1024 = vrot.lane.b32.xlu0 %v3715_v7, %s3912_s5 }
 0x7fd   :  { %1155 = vadd.xlane.f32.xlu1 %v1154_v39 }
 0x80e   :  { %1642 = vrot.lane.b32.xlu1 %v4325_v51, %s3919_s16 }
 0x812   :  { %1054 = vrot.lane.b32.xlu1 %v4327_v53, %s3914_s2 }
 0x825   :  { %v4394_v40 = vpop.f32.mrf.mxu1 }
 0x827   :  { %v3479_v41 = vpop.f32.mrf.mxu1 }
 0x84b   :  { %v1078_v42 = vpop.permute.xlu1 %1077  ;;  %v4396_v43 = vpop.permute.xlu0 %1486 }
 0x84c   :  { %3469 = vmatpush3.xpose.msk.msra.mxu0 %vm840_vm6, %v1078_v42 }
 0x84d   :  { %3480 = vmatprep.subr.mxu0 %v3915_v47 }
 0x84f   :  { %v4400_v44 = vpop.permute.xlu0 %1484  ;;  %3471 = vmatmul.mubr.msk.f32.vlgmr.msra.gmra.mxu0 %vm840_vm6, %v1012_v31 }
 0x850   :  { %3481 = vmatpush3.msra.mxu0 %v1231_v59  ;;  %3482 = vmatprep.mubr.msk.f32.mxu0 %vm3916_vm3, %v3915_v47 }
 0x851   :  { %3490 = vmatprep.subr.mxu0 %v3915_v47 }
 0x853   :  { %v1564_v0 = vpop.permute.xlu0 %1563 }
 0x854   :  { %v1566_v45 = vsel %vm840_vm6, %v1564_v0, 0.0  ;;  %v4494_v0 = vld [vmem:[#allocation5 + $0x18] sm:$0xff] }
 0x855   :  { %1567 = vadd.xlane.f32.xlu0 %v1566_v45 }
 0x857   :  { %v1025_v55 = vpop.permute.xlu0 %1024 }
 0x858   :  { %v1029_v58 = vmul.f32 %v1025_v55, %v4327_v53  ;;  %v4510_v55 = vld [vmem:[#allocation5 + $0x28] sm:$0xff] }
 0x86b   :  { %1912 = vrot.lane.b32.xlu0 %v1029_v58, %s3914_s2 }
 0x86f   :  { %2065 = vrot.lane.b32.xlu0 %v4327_v53, %s3913_s0 }
 0x873   :  { %2319 = vrot.lane.b32.xlu0 %v1029_v58, %s3917_s29  ;;  %v4526_v58 = vld [vmem:[#allocation5 + $0x38] sm:$0xff] }
 0x877   :  { %2317 = vrot.lane.b32.xlu0 %v4422_v62, %s3918_s1 }
 0x87b   :  { %1038 = vrot.lane.b32.xlu0 %v3719_v63, %s3912_s5 }
 0x87f   :  { %1040 = vrot.lane.b32.xlu0 %v3721_v1, %s3912_s5 }
 0x886   :  { %v1156_v3 = vpop.xlane.xlu1 %1155 }
 0x887   :  { %v1158_v24 = vmul.f32 %v4452_v21, %v1156_v3 }
 0x88a   :  { %v4428_v4 = vpop.permute.xlu1 %1642 }
 0x88e   :  { %v1055_v5 = vpop.permute.xlu1 %1054 }
 0x88f   :  { %v1059_v6 = vmul.f32 %v1055_v5, %v4327_v53 }
 0x891   :  { %v1068_v8 = vmul.f32 %v3280_v37, %v1059_v6 }
 0x893   :  { %v1989_v9 = vsel %vm840_vm6, %v1068_v8, 0.0 }
 0x894   :  { %1990 = vadd.xlane.f32.xlu1 %v1989_v9 }
 0x8a5   :  { %2396 = vrot.lane.b32.xlu1 %v1068_v8, %s3918_s1 }
 0x8a9   :  { %2475 = vrot.lane.b32.xlu1 %v4327_v53, %s3919_s16 }
 0x8de   :  { %v1568_v10 = vpop.xlane.xlu0 %1567 }
 0x8df   :  { %v1570_v59 = vmul.f32 %v4452_v21, %v1568_v10 }
 0x8e2   :  { %v1913_v11 = vpop.permute.xlu0 %1912 }
 0x8e6   :  { %v4435_v12 = vpop.permute.xlu0 %2065 }
 0x8ea   :  { %v4437_v13 = vpop.permute.xlu0 %2319 }
 0x8ee   :  { %v4439_v14 = vpop.permute.xlu0 %2317 }
 0x8f2   :  { %v1039_v15 = vpop.permute.xlu0 %1038 }
 0x8f3   :  { %v1044_v18 = vmul.f32 %v1039_v15, %v4325_v51 }
 0x8f6   :  { %v1041_v16 = vpop.permute.xlu0 %1040 }
 0x8f7   :  { %v4442_v17 = vmul.f32 %v1041_v16, %v4327_v53 }
 0x8f9   :  { %2186 = vrot.lane.b32.xlu0 %v4442_v17, %s3914_s2 }
 0x8fd   :  { %1352 = vrot.lane.b32.xlu0 %v1044_v18, %s3914_s2  ;;  %s4810_s2 = smov 16  }
 0x901   :  { %1766 = vrot.lane.b32.xlu0 %v1044_v18, %s3917_s29 }
 0x90f   :  { %v1150_v23 = vpop.f32.mrf.mxu0 }
 0x910   :  { %v1157_v25 = vmul.f32 %v1150_v23, %v4457_v22 }
 0x911   :  { %v3472_v27 = vpop.f32.mrf.mxu0 }
 0x912   :  { %v1159_v28 = vadd.f32 %v1158_v24, %v1157_v25 }
 0x914   :  { %3483 = vmatmul.mubr.msk.f32.vlgmr.msra.gmra.mxu0 %vm1233_vm7, %v1159_v28 }
 0x915   :  { %3491 = vmatpush3.xpose.msk.msra.mxu0 %vm840_vm6, %v4396_v43  ;;  %3492 = vmatprep.mubr.msk.f32.mxu0 %vm3916_vm3, %v3915_v47 }
 0x916   :  { %3502 = vmatprep.subr.mxu0 %v3915_v47 }
 0x918   :  { %3493 = vmatmul.mubr.msk.f32.vlgmr.msra.gmra.mxu0 %vm840_vm6, %v4400_v44 }
 0x919   :  { %3503 = vmatpush3.msra.mxu0 %v4428_v4  ;;  %3504 = vmatprep.mubr.msk.f32.mxu0 %vm3916_vm3, %v3915_v47 }
 0x91a   :  { %3512 = vmatprep.subr.mxu0 %v3915_v47 }
 0x91d   :  { %v4473_v29 = vpop.xlane.xlu1 %1990 }
 0x91e   :  { %v1993_v1 = vmul.f32 %v4452_v21, %v4473_v29 }
 0x921   :  { %v2397_v31 = vpop.permute.xlu1 %2396 }
 0x922   :  { %v2399_v32 = vsel %vm840_vm6, %v2397_v31, 0.0 }
 0x923   :  { %2400 = vadd.xlane.f32.xlu0 %v2399_v32 }
 0x925   :  { %v2476_v41 = vpop.permute.xlu1 %2475 }
 0x96b   :  { %v2187_v33 = vpop.permute.xlu0 %2186 }
 0x96f   :  { %v1353_v34 = vpop.permute.xlu0 %1352 }
 0x970   :  { %1355 = vxpose.xlu1.b32.start.end [1/1] (short) (narrow) %v1353_v34, 16 }
 0x973   :  { %v1767_v35 = vpop.permute.xlu0 %1766 }
 0x974   :  { %1769 = vxpose.xlu0.b32.start.end [1/1] (short) (narrow) %v1767_v35, 16 }
 0x975   :  { %2189 = vxpose.xlu1.b32.start.end [1/1] (short) (narrow) %v2187_v33, 16 }
 0x9ac   :  { %v4491_v42 = vpop.xlane.xlu0 %2400 }
 0x9d4   :  { %v4476_v2 = vpop.f32.mrf.mxu0 }
 0x9d6   :  { %v3484_v36 = vpop.f32.mrf.mxu0 }
 0x9d8   :  { %v1558_v37 = vpop.f32.mrf.mxu0 }
 0x9d9   :  { %v1569_v38 = vmul.f32 %v1558_v37, %v4457_v22  ;;  %v2403_v37 = vmul.f32 %v4452_v21, %v4491_v42  ;;  %v3262_v21 = vmul.f32 -1.442695, %v4325_v51 }
 0x9da   :  { %v3494_v7 = vpop.f32.mrf.mxu0 }
 0x9db   :  { %v1571_v39 = vadd.f32 %v1570_v59, %v1569_v38  ;;  %3722 = vpow2.f32 %v3262_v21 }
 0x9dd   :  { %3505 = vmatmul.mubr.msk.f32.vlgmr.msra.gmra.mxu0 %vm1233_vm7, %v1571_v39 }
 0x9de   :  { %3513 = vmatpush3.xpose.msk.msra.mxu0 %vm840_vm6, %v1913_v11  ;;  %3514 = vmatprep.mubr.msk.f32.mxu0 %vm3916_vm3, %v3915_v47 }
 0x9df   :  { %3524 = vmatprep.subr.mxu0 %v3915_v47 }
 0x9e1   :  { %3515 = vmatmul.mubr.msk.f32.vlgmr.msra.gmra.mxu0 %vm840_vm6, %v4422_v62 }
 0x9e2   :  { %3525 = vmatpush3.msra.mxu0 %v4435_v12  ;;  %3526 = vmatprep.mubr.msk.f32.mxu0 %vm3916_vm3, %v3915_v47 }
 0x9e3   :  { %3534 = vmatprep.subr.mxu0 %v3915_v47 }
 0x9ec   :  { %v1371_v43 = vpop.trf.xlu1 }
 0x9ed   :  { %3487 = vmatprep.mubr.msk.f32.mxu1 %vm1233_vm7, %v1371_v43 }
 0x9f0   :  { %v1372_v45 = vpop.trf.xlu1  ;;  %v1785_v48 = vpop.trf.xlu0 }
 0x9f1   :  { %3488 = vmatmul.mubr.msk.f32.vlgmr.msra.gmra.mxu1 %vm1233_vm7, %v1372_v45 }
 0x9f2   :  { %3496 = vmatpush3.msra.mxu1 %v4494_v0  ;;  %3499 = vmatprep.mubr.msk.f32.mxu1 %vm3916_vm3, %v3915_v47 }
 0x9f3   :  { %3497 = vmatprep.subr.mxu1 %v3915_v47 }
 0x9f4   :  { %3498 = vmatpush3.msra.mxu1 %v4497_v50  ;;  %v1786_v54 = vpop.trf.xlu0  ;;  %v2205_v56 = vpop.trf.xlu1 }
 0x9f5   :  { %3507 = vmatprep.subr.mxu1 %v4428_v4  ;;  %3500 = vmatmul.mubr.msk.f32.vlgmr.msra.gmra.mxu1 %vm840_vm6, %v4400_v44 }
 0x9f6   :  { %3508 = vmatpush3.msra.mxu1 %v4428_v4  ;;  %3509 = vmatprep.mubr.msk.f32.mxu1 %vm1233_vm7, %v1785_v48 }
 0x9f7   :  { %3517 = vmatprep.subr.mxu1 %v3915_v47 }
 0x9f8   :  { %v2206_v44 = vpop.trf.xlu1 }
 0x9f9   :  { %3510 = vmatmul.mubr.msk.f32.vlgmr.msra.gmra.mxu1 %vm1233_vm7, %v1786_v54 }
 0x9fa   :  { %3518 = vmatpush3.msra.mxu1 %v4510_v55  ;;  %3521 = vmatprep.mubr.msk.f32.mxu1 %vm3916_vm3, %v3915_v47 }
 0x9fb   :  { %3519 = vmatprep.subr.mxu1 %v3915_v47 }
 0x9fc   :  { %3520 = vmatpush3.msra.mxu1 %v4513_v57 }
 0x9fd   :  { %3529 = vmatprep.subr.mxu1 %v4435_v12  ;;  %3522 = vmatmul.mubr.msk.f32.vlgmr.msra.gmra.mxu1 %vm840_vm6, %v4422_v62 }
 0x9fe   :  { %3530 = vmatpush3.msra.mxu1 %v4435_v12  ;;  %3531 = vmatprep.mubr.msk.f32.mxu1 %vm1233_vm7, %v2205_v56  ;;  %v1304_v12 = vadd.f32 %v4476_v2, %v4394_v40  ;;  %v3263_v56 = vmul.f32 -1.442695, %v4327_v53 }
 0x9ff   :  { %3539 = vmatprep.subr.mxu1 %v3915_v47 }
 0xa00   :  { %v1470_v16 = vsel %vm840_vm6, %v1304_v12, 0.0  ;;  %3724 = vpow2.f32 %v3263_v56 }
 0xa01   :  { %3532 = vmatmul.mubr.msk.f32.vlgmr.msra.gmra.mxu1 %vm1233_vm7, %v2206_v44 }
 0xa02   :  { %3540 = vmatpush3.msra.mxu1 %v4526_v58  ;;  %3543 = vmatprep.mubr.msk.f32.mxu1 %vm3916_vm3, %v3915_v47 }
 0xa03   :  { %3541 = vmatprep.subr.mxu1 %v3915_v47 }
 0xa04   :  { %3542 = vmatpush3.msra.mxu1 %v4529_v60 }
 0xa05   :  { %3551 = vmatprep.subr.mxu1 %v2476_v41  ;;  %3544 = vmatmul.mubr.msk.f32.vlgmr.msra.gmra.mxu1 %vm840_vm6, %v4439_v14 }
 0xa06   :  { %3552 = vmatpush3.msra.mxu1 %v2476_v41 }
 0xa07   :  { %3564 = vmatprep.subr.bf16.mxu1 %v3915_v47 }
 0xa9d   :  { %v1714_v61 = vpop.f32.mrf.mxu0 }
 0xa9f   :  { %v3506_v62 = vpop.f32.mrf.mxu0 }
 0xaa1   :  { %v1985_v63 = vpop.f32.mrf.mxu0 }
 0xaa2   :  { %v1992_v3 = vmul.f32 %v1985_v63, %v4457_v22 }
 0xaa3   :  { %v3516_v4 = vpop.f32.mrf.mxu0 }
 0xaa4   :  { %v1994_v5 = vadd.f32 %v1993_v1, %v1992_v3 }
 0xaa6   :  { %3527 = vmatmul.mubr.msk.f32.vlgmr.msra.gmra.mxu0 %vm1233_vm7, %v1994_v5 }
 0xaa7   :  { %3535 = vmatpush3.xpose.msk.msra.mxu0 %vm840_vm6, %v4437_v13  ;;  %3536 = vmatprep.mubr.msk.f32.mxu0 %vm3916_vm3, %v3915_v47 }
 0xaa8   :  { %3546 = vmatprep.subr.mxu0 %v3915_v47 }
 0xaaa   :  { %3537 = vmatmul.mubr.msk.f32.vlgmr.msra.gmra.mxu0 %vm840_vm6, %v4439_v14 }
 0xaab   :  { %3547 = vmatpush3.msra.mxu0 %v2476_v41  ;;  %3548 = vmatprep.mubr.msk.f32.mxu0 %vm3916_vm3, %v3915_v47 }
 0xaac   :  { %3556 = vmatprep.subr.bf16.mxu0 %v3915_v47 }
 0xab1   :  { %v4553_v6 = vpop.f32.mrf.mxu1 }
 0xab3   :  { %v4555_v8 = vpop.f32.mrf.mxu1 }
 0xab5   :  { %v1638_v9 = vpop.f32.mrf.mxu1 }
 0xab6   :  { %v1715_v10 = vadd.f32 %v1714_v61, %v1638_v9 }
 0xab7   :  { %v3501_v11 = vpop.f32.mrf.mxu1 }
 0xab8   :  { %v1884_v13 = vsel %vm840_vm6, %v1715_v10, 0.0 }
 0xab9   :  { %1885 = vadd.xlane.f32.xlu1 %v1884_v13  ;;  %v4560_v14 = vpop.f32.mrf.mxu1 }
 0xabb   :  { %v4562_v15 = vpop.f32.mrf.mxu1 }
 0xabd   :  { %1471 = vadd.xlane.f32.xlu1 %v1470_v16  ;;  %v2061_v18 = vpop.f32.mrf.mxu1 }
 0xabf   :  { %v3523_v23 = vpop.f32.mrf.mxu1 }
 0xac0   :  { %v3723_v23 = vpop.eup %3722 }
 0xac1   :  { %v4565_v24 = vpop.f32.mrf.mxu1 }
 0xac3   :  { %v4567_v25 = vpop.f32.mrf.mxu1 }
 0xac5   :  { %v2471_v27 = vpop.f32.mrf.mxu1 }
 0xac7   :  { %v3545_v28 = vpop.f32.mrf.mxu1 }
 0xac8   :  { %v3725_v28 = vpop.eup %3724 }
 0xb42   :  { %v1886_v29 = vpop.xlane.xlu1 %1885 }
 0xb43   :  { %v1887_v40 = vmul.f32 0.0625, %v1886_v29  ;;  %v665_v29 = vadd.f32 1.0, %v3725_v28 }
 0xb45   :  { %v1888_v31 = vsub.f32 %v1715_v10, %v1887_v40 }
 0xb46   :  { %v1472_v54 = vpop.xlane.xlu1 %1471 }
 0xb47   :  { %v1889_v2 = vmul.f32 %v1888_v31, %v1888_v31  ;;  %v1474_v42 = vmul.f32 0.0625, %v1472_v54 }
 0xb49   :  { %v1890_v39 = vsel %vm840_vm6, %v1889_v2, 0.0  ;;  %v1475_v62 = vsub.f32 %v1304_v12, %v1474_v42  ;;  %v3306_v42 = vld [vmem:[%s4804_s3 + $0x3] ss:$0 sm:$0xff] }
 0xb4b   :  { %v1476_v11 = vmul.f32 %v1475_v62, %v1475_v62 }
 0xb4d   :  { %v1477_v16 = vsel %vm840_vm6, %v1476_v11, 0.0 }
 0xb66   :  { %v2137_v32 = vpop.f32.mrf.mxu0 }
 0xb67   :  { %v2138_v33 = vadd.f32 %v2137_v32, %v2061_v18 }
 0xb68   :  { %v3528_v34 = vpop.f32.mrf.mxu0 }
 0xb69   :  { %v2304_v35 = vsel %vm840_vm6, %v2138_v33, 0.0 }
 0xb6a   :  { %v2391_v36 = vpop.f32.mrf.mxu0  ;;  %2305 = vadd.xlane.f32.xlu1 %v2304_v35 }
 0xb6b   :  { %v2402_v59 = vmul.f32 %v2391_v36, %v4457_v22 }
 0xb6c   :  { %v3538_v38 = vpop.f32.mrf.mxu0 }
 0xb6d   :  { %v2404_v7 = vadd.f32 %v2403_v37, %v2402_v59 }
 0xb6e   :  { %1891 = vadd.xlane.f32.xlu1 %v1890_v39 }
 0xb6f   :  { %3549 = vmatmul.mubr.msk.f32.vlgmr.msra.gmra.mxu0 %vm1233_vm7, %v2404_v7 }
 0xb70   :  { %3560 = vmatprep.mubr.msk.bf16.mxu0 %vm3916_vm3, %v3915_v47 }
 0xbf3   :  { %v2306_v22 = vpop.xlane.xlu1 %2305 }
 0xbf4   :  { %v2307_v63 = vmul.f32 0.0625, %v2306_v22 }
 0xbf6   :  { %v2308_v5 = vsub.f32 %v2138_v33, %v2307_v63  ;;  %v3307_v63 = vld [vmem:[%s4805_s8 + $0x3] ss:$0 sm:$0xff] }
 0xbf7   :  { %v1892_v3 = vpop.xlane.xlu1 %1891 }
 0xbf8   :  { %v1893_v9 = vmul.f32 0.0625, %v1892_v3  ;;  %v2309_v18 = vmul.f32 %v2308_v5, %v2308_v5 }
 0xbfa   :  { %v1894_v13 = vadd.f32 0.00064, %v1893_v9  ;;  %v2310_v12 = vsel %vm840_vm6, %v2309_v18, 0.0 }
 0xbfc   :  { %3726 = vrsqrt.f32 %v1894_v13 }
 0xc09   :  { %v3727_v40 = vpop.eup %3726 }
 0xc0a   :  { %v1896_v32 = vmul.f32 %v3727_v40, %v1888_v31  ;;  %v3672_v31 = vld [vmem:[%s4767_s17 + $0x8] sm:$0xff]  }
 0xc0b   :  { %3557 = vmatpush3.bf16.msra.mxu0 %v3672_v31 }
 0xc0c   :  { %3558 = vmatprep.subr.bf16.mxu0 %v3915_v47 }
 0xc2f   :  { %v2547_v41 = vpop.f32.mrf.mxu0 }
 0xc30   :  { %v2548_v43 = vadd.f32 %v2547_v41, %v2471_v27  ;;  %v664_v27 = vadd.f32 1.0, %v3723_v23 }
 0xc31   :  { %v3550_v45 = vpop.f32.mrf.mxu0 }
 0xc32   :  { %v2717_v48 = vsel %vm840_vm6, %v2548_v43, 0.0  ;;  %3728 = vrcp.f32 %v664_v27 }
 0xc33   :  { %2718 = vadd.xlane.f32.xlu0 %v2717_v48  ;;  %3730 = vrcp.f32 %v665_v29 }
 0xc3f   :  { %v3729_v33 = vpop.eup %3728 }
 0xc40   :  { %v670_v34 = vmul.f32 %v3729_v33, %v4325_v51  ;;  %v3731_v35 = vpop.eup %3730  ;;  %v3673_v51 = vld [vmem:[%s4767_s17] sm:$0xff]   ;;  %v1046_v33 = vmul.f32 1.442695, %v4411_v52 }
 0xc41   :  { %v671_v2 = vmul.f32 %v3731_v35, %v4327_v53  ;;  %3559 = vmatpush3.bf16.msra.mxu0 %v3673_v51  ;;  %v1048_v35 = vmul.f32 1.442695, %v4409_v49 }
 0xc42   :  { %3572 = vmatprep.subr.bf16.mxu0 %v3915_v47 }
 0xcbc   :  { %v2719_v44 = vpop.xlane.xlu0 %2718 }
 0xcbd   :  { %v2720_v61 = vmul.f32 0.0625, %v2719_v44 }
 0xcbf   :  { %v2721_v1 = vsub.f32 %v2548_v43, %v2720_v61 }
 0xcc1   :  { %v2722_v4 = vmul.f32 %v2721_v1, %v2721_v1 }
 0xcc3   :  { %v2723_v10 = vsel %vm840_vm6, %v2722_v4, 0.0 }
 0xcc4   :  { %2724 = vadd.xlane.f32.xlu1 %v2723_v10 }
 0xcc8   :  { %1478 = vadd.xlane.f32.xlu1 %v1477_v16 }
 0xccc   :  { %2311 = vadd.xlane.f32.xlu1 %v2310_v12 }
 0xcdd   :  { %1902 = vrot.lane.b32.xlu1 %v1896_v32, %s4810_s2 }
 0xce1   :  { %2756 = vrot.lane.b32.xlu1 %v670_v34, %s3912_s5 }
 0xce5   :  { %2758 = vrot.lane.b32.xlu1 %v671_v2, %s3912_s5 }
 0xd4d   :  { %v2725_v36 = vpop.xlane.xlu1 %2724 }
 0xd4e   :  { %v2726_v37 = vmul.f32 0.0625, %v2725_v36 }
 0xd50   :  { %v2727_v59 = vadd.f32 0.00064, %v2726_v37 }
 0xd51   :  { %v1479_v7 = vpop.xlane.xlu1 %1478 }
 0xd52   :  { %3732 = vrsqrt.f32 %v2727_v59  ;;  %v1480_v39 = vmul.f32 0.0625, %v1479_v7 }
 0xd54   :  { %v1481_v41 = vadd.f32 0.00064, %v1480_v39 }
 0xd55   :  { %v2312_v43 = vpop.xlane.xlu1 %2311 }
 0xd56   :  { %3734 = vrsqrt.f32 %v1481_v41  ;;  %v2313_v45 = vmul.f32 0.0625, %v2312_v43 }
 0xd58   :  { %v2314_v48 = vadd.f32 0.00064, %v2313_v45 }
 0xd59   :  { %v1903_v22 = vpop.permute.xlu1 %1902 }
 0xd5a   :  { %3736 = vrsqrt.f32 %v2314_v48 }
 0xd5b   :  { %3738 = vpow2.f32 %v1046_v33 }
 0xd5c   :  { %3740 = vpow2.f32 %v1048_v35  ;;  %v3313_v35 = vld [vmem:[%s4768_s18] ss:$0 sm:$0xff] }
 0xd5f   :  { %v3733_v38 = vpop.eup %3732 }
 0xd60   :  { %v2729_v53 = vmul.f32 %v3733_v38, %v2721_v1  ;;  %v2757_v1 = vpop.permute.xlu1 %2756 }
 0xd62   :  { %2736 = vrot.lane.b32.xlu0 %v2729_v53, %s4810_s2 }
 0xd63   :  { %v3735_v54 = vpop.eup %3734 }
 0xd64   :  { %v1483_v21 = vmul.f32 %v3735_v54, %v1475_v62  ;;  %v2759_v13 = vpop.permute.xlu1 %2758 }
 0xd66   :  { %v1905_v56 = vsel %vm840_vm6, %v1483_v21, %v1903_v22 }
 0xd67   :  { %v3737_v44 = vpop.eup %3736  ;;  %v2745_v61 = vmul.f32 %v3306_v42, %v1905_v56 }
 0xd68   :  { %v2316_v3 = vmul.f32 %v3737_v44, %v2308_v5  ;;  %v3311_v44 = vld [vmem:[%s4804_s3 + $0x2] ss:$0 sm:$0xff] }
 0xd69   :  { %v2752_v10 = vadd.f32 %v3307_v63, %v2745_v61 }
 0xd6b   :  { %v2762_v16 = vmul.f32 %v2757_v1, %v2752_v10 }
 0xdd4   :  { %v2737_v4 = vpop.permute.xlu0 %2736 }
 0xdd5   :  { %v2739_v9 = vsel %vm840_vm6, %v2316_v3, %v2737_v4 }
 0xdd6   :  { %v2746_v62 = vmul.f32 %v3306_v42, %v2739_v9 }
 0xdd8   :  { %v2753_v11 = vadd.f32 %v3307_v63, %v2746_v62 }
 0xdda   :  { %v2763_v18 = vmul.f32 %v2759_v13, %v2753_v11  ;;  %v2873_v11 = vld [vmem:[#allocation7 + $0x1] sm:$0x1] }
 0xddc   :  { %v2764_v23 = vpack.c.bf16 %v2763_v18, %v2762_v16  ;;  %v2867_v18 = vld [vmem:[#allocation7] sm:$0x1] }
 0xdde   :  { %3561 = vmatmul.mubr.msk.bf16.vlgmr.msra.gmra.mxu0 %vm125_vm0, %v2764_v23 }
 0xddf   :  { %3588 = vmatprep.mubr.msk.bf16.mxu0 %vm3916_vm3, %v3915_v47 }
 0xe9e   :  { %v2818_v12 = vpop.f32.mrf.mxu0 }
 0xe9f   :  { %v4609_v27 = vadd.f32 %v2818_v12, %v4088_v26  ;;  %v3739_v26 = vpop.eup %3738 }
 0xea0   :  { %v3562_v5 = vpop.f32.mrf.mxu0 }
 0xea1   :  { %v2829_v28 = vsel %vm125_vm0, %v4609_v27, 0.0 }
 0xea2   :  { %2830 = vadd.xlane.f32.xlu1 %v2829_v28  ;;  %v2821_v29 = vpop.f32.mrf.mxu0 }
 0xea3   :  { %v4614_v40 = vadd.f32 %v2821_v29, %v4092_v30  ;;  %v3741_v30 = vpop.eup %3740 }
 0xea4   :  { %v3563_v32 = vpop.f32.mrf.mxu0 }
 0xea5   :  { %v2832_v34 = vsel %vm125_vm0, %v4614_v40, 0.0 }
 0xea6   :  { %2833 = vadd.xlane.f32.xlu0 %v2832_v34 }
 0xeb3   :  { %2599 = vrot.lane.b32.xlu1 %v4442_v17, %s3917_s29 }
 0xeb7   :  { %1719 = vrot.lane.b32.xlu1 %v3739_v26, %s3918_s1 }
 0xee0   :  { %1307 = vxpose.xlu1.b32.start.end [1/1] (short) (narrow) %v3739_v26, 16  ;;  %v3674_v26 = vld [vmem:[%s4769_s19 + $0x8] sm:$0xff]  }
 0xee5   :  { %2141 = vxpose.xlu1.b32.start.end [1/1] (short) (narrow) %v3741_v30, 16 }
 0xf03   :  { %3621 = vset.pattern.permute.xlu1 %v3911_v46 }
 0xf2b   :  { %v2831_v52 = vpop.xlane.xlu1 %2830 }
 0xf2c   :  { %v2835_v2 = vmul.f32 0.03125, %v2831_v52  ;;  %v3675_v52 = vld [vmem:[%s4769_s19] sm:$0xff]  }
 0xf2e   :  { %v2837_v36 = vsub.f32 %v4609_v27, %v2835_v2 }
 0xf2f   :  { %v2834_v37 = vpop.xlane.xlu0 %2833  ;;  %v2600_v53 = vpop.permute.xlu1 %2599 }
 0xf30   :  { %v2836_v59 = vmul.f32 0.03125, %v2834_v37  ;;  %v2839_v31 = vmul.f32 %v2837_v36, %v2837_v36 }
 0xf32   :  { %v2838_v17 = vsub.f32 %v4614_v40, %v2836_v59  ;;  %v2841_v51 = vsel %vm125_vm0, %v2839_v31, 0.0  ;;  %v3676_v59 = vld [vmem:[%s4771_s21 + $0x8] sm:$0xff]   ;;  %v3314_v31 = vld [vmem:[%s4768_s18 + $0x1] ss:$0 sm:$0xff] }
 0xf33   :  { %2842 = vadd.xlane.f32.xlu0 %v2841_v51  ;;  %v1720_v7 = vpop.permute.xlu1 %1719 }
 0xf34   :  { %v2840_v38 = vmul.f32 %v2838_v17, %v2838_v17 }
 0xf36   :  { %v2844_v49 = vsel %vm125_vm0, %v2840_v38, 0.0 }
 0xf37   :  { %2845 = vadd.xlane.f32.xlu0 %v2844_v49 }
 0xf5c   :  { %v1323_v39 = vpop.trf.xlu1 }
 0xf60   :  { %v1324_v41 = vpop.trf.xlu1 }
 0xf61   :  { %1346 = vperm.xlu1 %3621, %v1324_v41  }
 0xf64   :  { %2602 = vxpose.xlu0.b32.start.end [1/1] (short) (narrow) %v2600_v53, 16  ;;  %v2157_v43 = vpop.trf.xlu1  ;;  %v3677_v53 = vld [vmem:[%s4771_s21] sm:$0xff]  }
 0xf68   :  { %v2158_v10 = vpop.trf.xlu1 }
 0xf69   :  { %1722 = vxpose.xlu0.b32.start.end [1/1] (short) (narrow) %v1720_v7, 16 }
 0xf92   :  { %3620 = vset.pattern.permute.xlu0 %v3911_v46  ;;  %v3312_v46 = vld [vmem:[%s4805_s8 + $0x2] ss:$0 sm:$0xff] }
 0xf96   :  { %1341 = vperm.xlu0 %3620, %v1323_v39  }
 0xf9a   :  { %2175 = vperm.xlu0 %3620, %v2157_v43  }
 0xf9e   :  { %2552 = vrot.lane.b32.xlu0 %v3741_v30, %s3918_s1 }
 0xfbc   :  { %v2843_v45 = vpop.xlane.xlu0 %2842 }
 0xfbd   :  { %v2847_v48 = vmul.f32 0.03125, %v2843_v45 }
 0xfbf   :  { %v2849_v54 = vadd.f32 1e-05, %v2847_v48 }
 0xfc0   :  { %v2846_v21 = vpop.xlane.xlu0 %2845 }
 0xfc1   :  { %3742 = vrsqrt.f32 %v2849_v54  ;;  %v2848_v22 = vmul.f32 0.03125, %v2846_v21 }
 0xfc3   :  { %v2850_v42 = vadd.f32 1e-05, %v2848_v22  ;;  %v3678_v22 = vld [vmem:[%s4770_s20 + $0x38] sm:$0xff]  }
 0xfc4   :  { %3573 = vmatpush3.bf16.msra.mxu0 %v3678_v22 }
 0xfc5   :  { %3744 = vrsqrt.f32 %v2850_v42  ;;  %3574 = vmatprep.subr.bf16.mxu0 %v3915_v47 }
 0xfce   :  { %v3743_v56 = vpop.eup %3742 }
 0xfcf   :  { %v2853_v61 = vmul.f32 %v3743_v56, %v2837_v36 }
 0xfd1   :  { %v2859_v63 = vmul.f32 %v3311_v44, %v2853_v61  ;;  %v3684_v61 = vld [vmem:[%s4770_s20 + $0x8] sm:$0xff]  }
 0xfd2   :  { %v3745_v1 = vpop.eup %3744 }
 0xfd3   :  { %v2865_v3 = vadd.f32 %v3312_v46, %v2859_v63  ;;  %v2854_v4 = vmul.f32 %v3745_v1, %v2838_v17 }
 0xfd5   :  { %v2860_v9 = vmul.f32 %v3311_v44, %v2854_v4  ;;  %3149 = vst.msk [vmem:[#allocation12 - $0x7] sm:$0x80] %vm3147_vm1, %v2865_v3  ;;  %v2869_v16 = vrot.slane %v2865_v3, 7  ;;  %v3683_v44 = vld [vmem:[%s4770_s20 + $0x10] sm:$0xff]  }
 0xfd7   :  { %v2866_v62 = vadd.f32 %v3312_v46, %v2860_v9  ;;  %v2871_v28 = vsel %vm209_vm2, %v2867_v18, %v2869_v16  ;;  %v3685_v46 = vld [vmem:[%s4770_s20] sm:$0xff]  }
 0xfd8   :  { %v2878_v34 = vsub.f32 %v2871_v28, %v2865_v3 }
 0xfd9   :  { %v2875_v13 = vrot.slane %v2866_v62, 7  ;;  %3155 = vst.msk [vmem:[#allocation12 - $0x6] sm:$0x80] %vm3147_vm1, %v2866_v62 }
 0xfda   :  { %v2894_v49 = vmul.f32 %v3314_v31, %v2878_v34 }
 0xfdb   :  { %v2877_v12 = vsel %vm209_vm2, %v2873_v11, %v2875_v13 }
 0xfdc   :  { %v1347_v23 = vpop.permute.xlu1 %1346  ;;  %v2879_v32 = vsub.f32 %v2877_v12, %v2866_v62  ;;  %v2896_v39 = vadd.f32 %v2894_v49, %v2865_v3 }
 0xfdd   :  { %v1350_v5 = vmul.f32 %v1347_v23, %v4361_v19 }
 0xfde   :  { %v2886_v19 = vmul.f32 %v3313_v35, %v2879_v32  ;;  %v2895_v51 = vmul.f32 %v3314_v31, %v2879_v32 }
 0xfdf   :  { %v1469_v29 = vadd.f32 %v4553_v6, %v1350_v5  ;;  %v2885_v6 = vmul.f32 %v3313_v35, %v2878_v34 }
 0xfe0   :  { %v2618_v33 = vpop.trf.xlu0  ;;  %v2888_v2 = vadd.f32 %v2886_v19, %v2866_v62  ;;  %v2897_v7 = vadd.f32 %v2895_v51, %v2866_v62 }
 0xfe1   :  { %1898 = vst.msk [vmem:[#allocation11 + $0x8] sm:$0xff] %vm840_vm6, %v1469_v29  ;;  %3553 = vmatprep.mubr.msk.f32.mxu1 %vm1233_vm7, %v2618_v33  ;;  %v2887_v37 = vadd.f32 %v2885_v6, %v2865_v3 }
 0xfe2   :  { %v3069_v41 = vpack.c.bf16 %v2897_v7, %v2896_v39 }
 0xfe3   :  { %v2898_v17 = vpack.c.bf16 %v2888_v2, %v2887_v37 }
 0xfe4   :  { %v2619_v30 = vpop.trf.xlu0 }
 0xfe5   :  { %3554 = vmatmul.mubr.msk.f32.vlgmr.msra.gmra.mxu1 %vm1233_vm7, %v2619_v30 }
 0xfe6   :  { %3565 = vmatpush3.bf16.msra.mxu1 %v3674_v26  ;;  %3568 = vmatprep.mubr.msk.bf16.mxu1 %vm3916_vm3, %v3915_v47 }
 0xfe7   :  { %3566 = vmatprep.subr.bf16.mxu1 %v3915_v47 }
 0xfe8   :  { %v1738_v36 = vpop.trf.xlu0 }
 0xfe9   :  { %1756 = vperm.xlu1 %3621, %v1738_v36  }
 0xfea   :  { %3567 = vmatpush3.bf16.msra.mxu1 %v3675_v52 }
 0xfeb   :  { %3592 = vmatprep.subr.bf16.mxu1 %v3915_v47 }
 0xfec   :  { %v1739_v38 = vpop.trf.xlu0 }
 0xfed   :  { %3569 = vmatmul.mubr.msk.bf16.vlgmr.msra.gmra.mxu1 %vm125_vm0, %v2898_v17  ;;  %1761 = vperm.xlu1 %3621, %v1739_v38  }
 0xfee   :  { %3593 = vmatpush3.bf16.msra.mxu1 %v3676_v59  ;;  %3596 = vmatprep.mubr.msk.bf16.mxu1 %vm3916_vm3, %v3915_v47 }
 0xfef   :  { %3594 = vmatprep.subr.bf16.mxu1 %v3915_v47 }
 0xff1   :  { %2180 = vperm.xlu1 %3621, %v2158_v10  }
 0xff2   :  { %3595 = vmatpush3.bf16.msra.mxu1 %v3677_v53 }
 0xff5   :  { %3597 = vmatmul.mubr.msk.bf16.vlgmr.msra.gmra.mxu1 %vm125_vm0, %v3069_v41 }
0x1011   :  { %v1342_v43 = vpop.permute.xlu0 %1341 }
0x1012   :  { %v1349_v45 = vmul.f32 %v1342_v43, %v4365_v20  ;;  %v3679_v20 = vld [vmem:[%s4770_s20 + $0x30] sm:$0xff]  }
0x1013   :  { %3575 = vmatpush3.bf16.msra.mxu0 %v3679_v20 }
0x1014   :  { %v1468_v48 = vadd.f32 %v4555_v8, %v1349_v45  ;;  %3576 = vmatprep.subr.bf16.mxu0 %v3915_v47  ;;  %v3681_v8 = vld [vmem:[%s4770_s20 + $0x20] sm:$0xff]  }
0x1015   :  { %v2176_v54 = vpop.permute.xlu0 %2175 }
0x1016   :  { %1897 = vst.msk [vmem:[#allocation11] sm:$0xff] %vm840_vm6, %v1468_v48  ;;  %v2183_v21 = vmul.f32 %v2176_v54, %v4513_v57  ;;  %v3680_v57 = vld [vmem:[%s4770_s20 + $0x28] sm:$0xff]  }
0x1017   :  { %3577 = vmatpush3.bf16.msra.mxu0 %v3680_v57 }
0x1018   :  { %v2302_v42 = vadd.f32 %v4567_v25, %v2183_v21  ;;  %3578 = vmatprep.subr.bf16.mxu0 %v3915_v47  ;;  %v3682_v25 = vld [vmem:[%s4770_s20 + $0x18] sm:$0xff]   ;;  %s3920_s20 = smov [#allocation9]  }
0x1019   :  { %v2553_v56 = vpop.permute.xlu0 %2552  ;;  %s3173_s1 = sshll.u32 %s3920_s20, 4  ;;  %s3174_s1 = int_to_ptr.vmem [resolvable:$true] %s3173_s1 }
0x101a   :  { %2731 = vst.msk [vmem:[#allocation11 + $0x20] sm:$0xff] %vm840_vm6, %v2302_v42  ;;  %2555 = vxpose.xlu0.b32.start.end [1/1] (short) (narrow) %v2553_v56, 16  ;;  %s3814_s16 = scalar_lea.vmem %s3174_s1, 32  ;;  %p3819_p2 = scmp.lt.s32.totalorder %s3174_s1, %s3174_s1 }
0x101b   :  { %3579 = vmatpush3.bf16.msra.mxu0 %v3681_v8  ;;  %p3815_p1 = scmp.ne.s32.totalorder %s3174_s1, %s3814_s16  ;;  %p3820_p3 = scmp.lt.s32.totalorder %s3814_s16, %s3814_s16 }
0x101c   :  { %3580 = vmatprep.subr.bf16.mxu0 %v3915_v47 }
0x101d   :  { %p3821_p4 = por %p3820_p3, %p3819_p2 }
0x101f   :  { %3581 = vmatpush3.bf16.msra.mxu0 %v3682_v25  ;;  %p3822_p5 = pnand %p3821_p4, %p3815_p1 }
0x1020   :  { %3582 = vmatprep.subr.bf16.mxu0 %v3915_v47 }
0x1023   :  { %3583 = vmatpush3.bf16.msra.mxu0 %v3683_v44 }
0x1024   :  { %3584 = vmatprep.subr.bf16.mxu0 %v3915_v47 }
0x1027   :  { %3585 = vmatpush3.bf16.msra.mxu0 %v3684_v61 }
0x1028   :  { %3586 = vmatprep.subr.bf16.mxu0 %v3915_v47 }
0x102b   :  { %3587 = vmatpush3.bf16.msra.mxu0 %v3685_v46 }
0x1064   :  { %v1757_v63 = vpop.permute.xlu1 %1756 }
0x1065   :  { %v1764_v1 = vmul.f32 %v1757_v63, %v4497_v50 }
0x1067   :  { %v1882_v3 = vadd.f32 %v4562_v15, %v1764_v1 }
0x1068   :  { %v1762_v4 = vpop.permute.xlu1 %1761 }
0x1069   :  { %1899 = vst.msk [vmem:[#allocation11 + $0x10] sm:$0xff] %vm840_vm6, %v1882_v3  ;;  %v1765_v9 = vmul.f32 %v1762_v4, %v4494_v0 }
0x106b   :  { %v1883_v10 = vadd.f32 %v4560_v14, %v1765_v9 }
0x106c   :  { %v2181_v62 = vpop.permute.xlu1 %2180 }
0x106d   :  { %1900 = vst.msk [vmem:[#allocation11 + $0x18] sm:$0xff] %vm840_vm6, %v1883_v10  ;;  %v2184_v47 = vmul.f32 %v2181_v62, %v4510_v55 }
0x106f   :  { %v2303_v11 = vadd.f32 %v4565_v24, %v2184_v47 }
0x1071   :  { %2732 = vst.msk [vmem:[#allocation11 + $0x28] sm:$0xff] %vm840_vm6, %v2303_v11 }
0x1096   :  { %v2571_v13 = vpop.trf.xlu0 }
0x1097   :  { %2589 = vperm.xlu1 %3621, %v2571_v13  }
0x109a   :  { %v2572_v50 = vpop.trf.xlu0 }
0x109b   :  { %2594 = vperm.xlu1 %3621, %v2572_v50  }
0x10a5   :  { %v3555_v15 = vpop.f32.mrf.mxu1 }
0x10a7   :  { %v2706_v16 = vpop.f32.mrf.mxu1 }
0x10ad   :  { %v2952_v18 = vpop.f32.mrf.mxu1 }
0x10ae   :  { %v2959_v0 = vmax.f32 %v2952_v18, 0.0 }
0x10af   :  { %v3570_v23 = vpop.f32.mrf.mxu1 }
0x10b0   :  { %v2961_v28 = vmul.f32 %v2959_v0, %v2959_v0 }
0x10b1   :  { %v2955_v12 = vpop.f32.mrf.mxu1 }
0x10b2   :  { %v2960_v14 = vmax.f32 %v2955_v12, 0.0 }
0x10b3   :  { %v3571_v5 = vpop.f32.mrf.mxu1 }
0x10b4   :  { %v2962_v29 = vmul.f32 %v2960_v14, %v2960_v14 }
0x10b5   :  { %v3123_v32 = vpop.f32.mrf.mxu1 }
0x10b6   :  { %v2963_v55 = vpack.c.bf16 %v2962_v29, %v2961_v28 }
0x10b7   :  { %v3598_v33 = vpop.f32.mrf.mxu1 }
0x10b8   :  { %3589 = vmatmul.mubr.bf16.vlgmr.msra.gmra.mxu0 %v2963_v55 }
0x10b9   :  { %v3126_v24 = vpop.f32.mrf.mxu1 }
0x10bb   :  { %v3599_v34 = vpop.f32.mrf.mxu1 }
0x10bc   :  { %3825 = shalt.err (!%p3822_p5)
}
0x10bd   :  { %s4811_s15 = smov 1   ;;  %s3921_s6 = smov [#allocation12]  }
0x10be   :  { %3179 = dma.vmem_to_hbm [thread:$0]  %s3174_s1, 32, %s4773_s23, [#allocation10], %s4810_s2, %s4810_s2, %s4811_s15  }
0x10bf   :  { %s3197_s27 = sshll.u32 %s3921_s6, 4  ;;  %s3198_s27 = int_to_ptr.vmem [resolvable:$true] %s3197_s27 }
0x10c0   :  { %s3834_s19 = scalar_lea.vmem %s3198_s27, 32  ;;  %p3839_p7 = scmp.lt.s32.totalorder %s3198_s27, %s3198_s27 }
0x10c1   :  { %p3835_p6 = scmp.ne.s32.totalorder %s3198_s27, %s3834_s19  ;;  %p3840_p8 = scmp.lt.s32.totalorder %s3834_s19, %s3834_s19 }
0x10c3   :  { %p3841_p9 = por %p3840_p8, %p3839_p7 }
0x10c5   :  { %p3842_p10 = pnand %p3841_p9, %p3835_p6 }
0x10c7   :  { %3845 = shalt.err (!%p3842_p10)
}
0x10c8   :  { %3203 = dma.vmem_to_hbm [thread:$0]  %s3198_s27, 32, %s4775_s25, [#allocation13], %s4810_s2, %s4810_s2, %s4811_s15  }
0x10c9   :  { %s3922_s23 = smov [#allocation11]  }
0x10ca   :  { %s3185_s21 = sshll.u32 %s3922_s23, 4  ;;  %s3186_s21 = int_to_ptr.vmem [resolvable:$true] %s3185_s21 }
0x10cb   :  { %s3854_s28 = scalar_lea.vmem %s3186_s21, 1024  ;;  %p3859_p12 = scmp.lt.s32.totalorder %s3186_s21, %s3186_s21 }
0x10cc   :  { %p3855_p11 = scmp.ne.s32.totalorder %s3186_s21, %s3854_s28  ;;  %p3860_p13 = scmp.lt.s32.totalorder %s3854_s28, %s3854_s28 }
0x10ce   :  { %p3861_p0 = por %p3860_p13, %p3859_p12 }
0x10d0   :  { %p3862_p1 = pnand %p3861_p0, %p3855_p11 }
0x1112   :  { %v2590_v26 = vpop.permute.xlu1 %2589 }
0x1113   :  { %v2597_v35 = vmul.f32 %v2590_v26, %v4529_v60 }
0x1115   :  { %v2715_v19 = vadd.f32 %v2706_v16, %v2597_v35 }
0x1116   :  { %v2595_v30 = vpop.permute.xlu1 %2594 }
0x1117   :  { %2733 = vst.msk [vmem:[#allocation11 + $0x30] sm:$0xff] %vm840_vm6, %v2715_v19  ;;  %v2598_v6 = vmul.f32 %v2595_v30, %v4526_v58 }
0x1119   :  { %v2716_v52 = vadd.f32 %v3555_v15, %v2598_v6 }
0x111b   :  { %2734 = vst.msk [vmem:[#allocation11 + $0x38] sm:$0xff] %vm840_vm6, %v2716_v52 }
0x111c   :  { %3865 = shalt.err (!%p3862_p1)
}
0x111d   :  { %s4812_s25 = smov 8   ;;  %s4813_s2 = smov 128   ;;  %v3329_v60 = vmul.f32 -1.442695, %v3123_v32  ;;  %v3330_v58 = vmul.f32 -1.442695, %v3126_v24 }
0x111e   :  { %3191 = dma.vmem_to_hbm [thread:$0]  %s3186_s21, 1024, %s4774_s24, [#allocation10], %s4813_s2, %s4813_s2, %s4812_s25  }
0x111f   :  { %3746 = vpow2.f32 %v3329_v60  ;;  %s3923_s5 = smov [#allocation8]  }
0x1120   :  { %3748 = vpow2.f32 %v3330_v58  ;;  %s3161_s24 = sshll.u32 %s3923_s5, 4  ;;  %s3162_s24 = int_to_ptr.vmem [resolvable:$true] %s3161_s24 }
0x1121   :  { %s3874_s17 = scalar_lea.vmem %s3162_s24, 256  ;;  %p3879_p3 = scmp.lt.s32.totalorder %s3162_s24, %s3162_s24 }
0x1122   :  { %p3875_p2 = scmp.ne.s32.totalorder %s3162_s24, %s3874_s17  ;;  %p3880_p4 = scmp.lt.s32.totalorder %s3874_s17, %s3874_s17 }
0x1124   :  { %p3881_p5 = por %p3880_p4, %p3879_p3 }
0x1126   :  { %p3882_p6 = pnand %p3881_p5, %p3875_p2 }
0x112c   :  { %v3747_v2 = vpop.eup %3746 }
0x112d   :  { %v3136_v36 = vadd.f32 1.0, %v3747_v2  ;;  %v3749_v37 = vpop.eup %3748 }
0x112e   :  { %v3137_v59 = vadd.f32 1.0, %v3749_v37 }
0x112f   :  { %3750 = vrcp.f32 %v3136_v36 }
0x1130   :  { %3752 = vrcp.f32 %v3137_v59 }
0x113c   :  { %v3751_v31 = vpop.eup %3750 }
0x113d   :  { %v3753_v53 = vpop.eup %3752 }
0x1178   :  { %v3062_v17 = vpop.f32.mrf.mxu0 }
0x1179   :  { %v3142_v51 = vmul.f32 %v3751_v31, %v3062_v17 }
0x117a   :  { %v3590_v38 = vpop.f32.mrf.mxu0 }
0x117b   :  { %v3144_v49 = vadd.f32 %v3142_v51, %v4609_v27 }
0x117c   :  { %v3065_v7 = vpop.f32.mrf.mxu0 }
0x117d   :  { %3146 = vst.msk [vmem:[#allocation8] sm:$0xff] %vm125_vm0, %v3144_v49  ;;  %v3143_v39 = vmul.f32 %v3753_v53, %v3065_v7 }
0x117e   :  { %v3591_v41 = vpop.f32.mrf.mxu0 }
0x117f   :  { %v3145_v43 = vadd.f32 %v3143_v39, %v4614_v40 }
0x1181   :  { %3151 = vst.msk [vmem:[#allocation8 + $0x8] sm:$0xff] %vm125_vm0, %v3145_v43 }
0x1182   :  { %3885 = shalt.err (!%p3882_p6)
}
0x1183   :  { %3167 = dma.vmem_to_hbm [thread:$0]  %s3162_s24, 256, %s4772_s22, [#allocation4], %s4813_s2, %s4813_s2, %s4812_s25  }
0x1184   :  { %3898 = dma.done.wait [#allocation4], 256  }
0x1185   :  { %3899 = vsyncadd [#allocation4], 4294967040 }
0x1186   :  { %3900 = dma.done.wait [#allocation10], 1056  }
0x1187   :  { %3901 = vsyncadd [#allocation10], 4294966240 }
0x1188   :  { %3902 = dma.done.wait [#allocation13], 32  }
0x1189   :  { %3903 = vsyncadd [#allocation13], 4294967264 }
0x118a   :  { %3216 = vsyncpa [#allocation3], 1 }
0x118b   :  { %3217 = vsyncpa [#allocation6], 1 }
0x118c   :  { %3218 = vsyncpa [#allocation4], 1 }
0x118d   :  { %3219 = vsyncpa [#allocation10], 1 }
0x118e   :  { %3220 = vsyncpa [#allocation13], 1 }

</bundles_post_ra>
